<compile_context>
chip_gen: v7x
topology: tpu7x:2x2x1
jax: 0.10.0
libtpu: 0.0.40
codegen_flags: <defaults>
</compile_context>

<pallas_src>
import jax
import jax.numpy as jnp
from jax.experimental import pallas as pl
from jax.experimental.pallas import tpu as pltpu


# ---------------------------------------------------------------------------
# Kernel
# ---------------------------------------------------------------------------
def _make_kernel(chunk, n_chunks, L_pad, E):
    """Kernel factory: per grid step processes items (TB, L_pad, E) in `n_chunks`
    sub-chunks of `chunk` batch rows each (TB = chunk * n_chunks)."""

    def kernel(items_ref, uproj_ref, mask_ref, w1a_ref, w2_ref, out_ref):
        w1a = w1a_ref[...]            # (E, E)   compute dtype (bf16/f32)
        w2v = w2_ref[...]             # (1, E)   f32

        def compute(it, up, mk):
            # it: (chunk, L_pad, E) compute dtype; up: (chunk, E) f32;
            # mk: (chunk, L_pad, 1) f32.
            rows = chunk * L_pad
            # attn1 "items" half: one MXU-shaped (rows, E) @ (E, E) matmul,
            # bf16 in / f32 accumulate.  L_pad is a multiple of the sublane pack,
            # so the reshape is layout-free.
            h = jnp.dot(it.reshape(rows, E), w1a,
                        preferred_element_type=jnp.float32)
            # Add hoisted user projection (user @ W1b^T + b1), ReLU.
            h = jnp.maximum(h.reshape(chunk, L_pad, E) + up[:, None, :], 0.0)
            # attn2 (E -> 1): VPU mul + lane reduce with keepdims -> (chunk, L_pad, 1).
            # (b2 omitted: uniform pre-softmax shift over L cancels exactly.)
            logits = jnp.sum(h * w2v, axis=-1, keepdims=True) + mk
            # Softmax over L along the sublane axis (axis=1).
            m = jnp.max(logits, axis=1, keepdims=True)              # (chunk, 1, 1)
            e = jnp.exp(logits - m)                                 # (chunk, L_pad, 1)
            s = jnp.sum(e, axis=1)                                  # (chunk, 1)
            # Weighted sum over items: `e` broadcasts over the lane axis E.
            num = jnp.sum(e * it.astype(jnp.float32), axis=1)       # (chunk, E)
            # Deferred normalization on the EUP (approx reciprocal).
            return num * pl.reciprocal(s, approx=True)              # (chunk, E)

        if n_chunks == 1:
            out_ref[...] = compute(items_ref[...], uproj_ref[...],
                                   mask_ref[...]).astype(out_ref.dtype)
        else:
            def body(c, carry):
                c0 = pl.multiple_of(c * chunk, chunk)
                out = compute(items_ref[pl.ds(c0, chunk)],
                              uproj_ref[pl.ds(c0, chunk)],
                              mask_ref[pl.ds(c0, chunk)])
                out_ref[pl.ds(c0, chunk), :] = out.astype(out_ref.dtype)
                return carry
            jax.lax.fori_loop(0, n_chunks, body, 0)

    return kernel


# ---------------------------------------------------------------------------
# Block / budget selection helpers
# ---------------------------------------------------------------------------
def _is_v7x():
    try:
        kind = jax.devices()[0].device_kind
    except Exception:
        return False
    return "v7" in kind.lower()


def _select_block_batch(B, L_pad, E, in_itemsize, *, is_v7x):
    """Largest batch-block TB that divides B, is layout-safe (TB % 8 == 0 or
    TB == B), and whose double-buffered input blocks fit the per-generation
    budget.  grid >= 2 is only preferred on v7x (2 TensorCores)."""
    in_budget = (16 << 20) if is_v7x else (32 << 20)

    def in_bytes(tb):
        items_b = tb * L_pad * E * in_itemsize
        uproj_b = tb * E * 4
        mask_b = tb * L_pad * 4
        return 2 * (items_b + uproj_b + mask_b)          # double-buffered

    valid = [tb for tb in range(1, B + 1)
             if B % tb == 0 and (tb % 8 == 0 or tb == B)]
    fits = [tb for tb in valid if in_bytes(tb) <= in_budget] or [min(valid)]
    if is_v7x:
        multi = [tb for tb in fits if B // tb >= 2]
        if multi:
            fits = multi
    return max(fits)


def _pick_chunk(TB, L_pad, max_rows=512):
    """Largest divisor of TB keeping the live f32 h tile at <= max_rows MXU rows
    (bounds vreg pressure when the DMA block is large)."""
    divs = [c for c in range(1, TB + 1) if TB % c == 0]
    fits = [c for c in divs if c * L_pad <= max_rows]
    return max(fits) if fits else 1


def _vmem_limit_bytes(TB, L_pad, E, in_itemsize, out_itemsize, chunk, is_v7x):
    """Derive the scoped-VMEM request from the actual chosen blocks."""
    items_blk = TB * L_pad * E * in_itemsize
    uproj_blk = TB * E * 4
    mask_blk = TB * L_pad * 4
    w_blk = E * E * in_itemsize + E * 4
    out_blk = TB * E * out_itemsize
    pipelined = 2 * (items_blk + uproj_blk + mask_blk + w_blk + out_blk)
    scratch = 4 * chunk * L_pad * E * 4 + (2 << 20)      # h / logits / headroom
    cap = (48 << 20) if is_v7x else (100 << 20)          # 64 MiB vs 128 MiB VMEM
    return int(min(cap, max(16 << 20, pipelined + scratch)))


# ---------------------------------------------------------------------------
# Wrapper
# ---------------------------------------------------------------------------
def attn_layer_pallas(items, user, items_mask, w1, b1, w2, b2,
                      *, compute_dtype=jnp.bfloat16):
    """items: (B,L,E), user: (B,E), items_mask: (B,L) additive logit mask;
       w1: (E, 2E), b1: (E,), w2: (1, E), b2: (1,)  (PyTorch Linear conventions)."""
    B, L, E = items.shape
    f32 = jnp.float32
    del b2                                 # uniform pre-softmax shift -> no effect

    cdt = jnp.dtype(compute_dtype)
    pack = 16 if cdt.itemsize == 2 else 8  # sublane pack of the MXU-input dtype
    L_pad = ((L + pack - 1) // pack) * pack
    assert L_pad % pack == 0

    # Hoist the "user" half of attn1 (+ b1) out of the kernel as one XLA matmul.
    w1a_t = w1[:, :E].T.astype(cdt)                                   # (E, E)
    uproj = (jnp.dot(user.astype(f32), w1[:, E:].astype(f32).T,
                     precision=jax.lax.Precision.HIGHEST)
             + b1.astype(f32)[None, :])                               # (B, E) f32
    w2_r = w2.astype(f32).reshape(1, E)                               # (1, E) f32

    # bf16 items stream + L padded to the sublane pack (layout-free flatten).
    items_c = items.astype(cdt)
    mask_r = items_mask.astype(f32)[:, :, None]                       # (B, L, 1)
    if L_pad != L:
        items_c = jnp.pad(items_c, ((0, 0), (0, L_pad - L), (0, 0)))
        mask_r = jnp.pad(mask_r, ((0, 0), (0, L_pad - L), (0, 0)),
                         constant_values=-jnp.inf)                    # exact: exp(-inf)=0

    is_v7x = _is_v7x()
    TB = _select_block_batch(B, L_pad, E, cdt.itemsize, is_v7x=is_v7x)
    chunk = _pick_chunk(TB, L_pad)
    n_chunks = TB // chunk
    grid = (B // TB,)
    vmem_limit = _vmem_limit_bytes(TB, L_pad, E, cdt.itemsize,
                                   items.dtype.itemsize, chunk, is_v7x)

    kernel = _make_kernel(chunk, n_chunks, L_pad, E)

    out = pl.pallas_call(
        kernel,
        out_shape=jax.ShapeDtypeStruct((B, E), items.dtype),
        grid=grid,
        in_specs=[
            pl.BlockSpec((TB, L_pad, E), lambda i: (i, 0, 0)),   # items (compute dtype)
            pl.BlockSpec((TB, E), lambda i: (i, 0)),             # user proj (+ b1), f32
            pl.BlockSpec((TB, L_pad, 1), lambda i: (i, 0, 0)),   # additive mask, sublane-major
            pl.BlockSpec((E, E), lambda i: (0, 0)),              # W1a^T (grid-invariant)
            pl.BlockSpec((1, E), lambda i: (0, 0)),              # w2 row
        ],
        out_specs=pl.BlockSpec((TB, E), lambda i: (i, 0)),       # lane-dense (B, E) slab
        compiler_params=pltpu.CompilerParams(
            dimension_semantics=("parallel",),
            vmem_limit_bytes=vmem_limit),
    )(items_c, uproj, mask_r, w1a_t, w2_r)

    return out


# ---------------------------------------------------------------------------
# Pure-JAX reference (mirrors the PyTorch forward, f32 / highest precision)
# ---------------------------------------------------------------------------
def attn_layer_ref(items, user, items_mask, w1, b1, w2, b2):
    hp = jax.lax.Precision.HIGHEST
    B, L, E = items.shape
    user_e = jnp.broadcast_to(user[:, None, :], (B, L, E))
    h = jnp.concatenate([items, user_e], axis=-1)                  # (B, L, 2E)
    h = jnp.maximum(jnp.einsum("blk,ek->ble", h, w1, precision=hp) + b1, 0.0)
    logits = jnp.einsum("ble,oe->blo", h, w2, precision=hp) + b2 + items_mask[..., None]
    a = jax.nn.softmax(logits, axis=1)
    return jnp.sum(a * items, axis=1)                              # (B, E)


if __name__ == "__main__":
    B, L, E = 16, 8, 128
    key = jax.random.PRNGKey(0)
    k_items, k_user, k_mask, k_w1, k_b1, k_w2, k_b2 = jax.random.split(key, 7)

    items = jax.random.normal(k_items, (B, L, E), jnp.float32)
    user = jax.random.normal(k_user, (B, E), jnp.float32)
    # additive mask: 0 for valid items, large negative for masked positions
    mask_bits = jax.random.bernoulli(k_mask, 0.75, (B, L))
    items_mask = jnp.where(mask_bits, 0.0, -1e9).astype(jnp.float32)

    # Deterministic synthetic parameters (PyTorch nn.Linear shapes).
    bound1 = 1.0 / jnp.sqrt(2.0 * E)
    w1 = jax.random.uniform(k_w1, (E, 2 * E), jnp.float32, -bound1, bound1)
    b1 = jax.random.uniform(k_b1, (E,), jnp.float32, -bound1, bound1)
    bound2 = 1.0 / jnp.sqrt(1.0 * E)
    w2 = jax.random.uniform(k_w2, (1, E), jnp.float32, -bound2, bound2)
    b2 = jax.random.uniform(k_b2, (1,), jnp.float32, -bound2, bound2)

    out = attn_layer_pallas(items, user, items_mask, w1, b1, w2, b2)
    out = jax.block_until_ready(out)

    ref = attn_layer_ref(items, user, items_mask, w1, b1, w2, b2)
    assert out.shape == (B, E)
    max_err = float(jnp.max(jnp.abs(out - ref)))
    # bf16 MXU inputs + approx reciprocal -> looser tolerance than the f32 path.
    assert jnp.allclose(out, ref, atol=3e-2, rtol=3e-2), \
        f"mismatch vs reference (max abs err {max_err})"

    print("KERNEL_OK")
</pallas_src>

<mosaic_0001>
module attributes {stable_mosaic.version = 11 : i64} {
  func.func @kernel(%arg0: i32, %arg1: memref<16x16x128xbf16, #tpu.memory_space<vmem>>, %arg2: memref<16x128xf32, #tpu.memory_space<vmem>>, %arg3: memref<16x16x1xf32, #tpu.memory_space<vmem>>, %arg4: memref<128x128xbf16, #tpu.memory_space<vmem>>, %arg5: memref<1x128xf32, #tpu.memory_space<vmem>>, %arg6: memref<16x128xf32, #tpu.memory_space<vmem>>) attributes {dimension_semantics = [#tpu.dimension_semantics<parallel>], iteration_bounds = array<i64: 1>, scalar_prefetch = 0 : i64, scratch_operands = 0 : i64, tpu.core_type = #tpu.core_type<tc>, window_params = [{transform_indices = @transform_0, window_bounds = array<i64: 16, 16, 128>}, {transform_indices = @transform_1, window_bounds = array<i64: 16, 128>}, {transform_indices = @transform_2, window_bounds = array<i64: 16, 16, 1>}, {pipeline_mode = #tpu.pipeline_mode<synchronous>, transform_indices = @transform_3, window_bounds = array<i64: 128, 128>}, {pipeline_mode = #tpu.pipeline_mode<synchronous>, transform_indices = @transform_4, window_bounds = array<i64: 1, 128>}, {transform_indices = @transform_5, window_bounds = array<i64: 16, 128>}]} {
    %c0 = arith.constant 0 : index
    %c0_0 = arith.constant 0 : index
    %0 = vector.load %arg4[%c0, %c0_0] : memref<128x128xbf16, #tpu.memory_space<vmem>>, vector<128x128xbf16>
    %c0_1 = arith.constant 0 : index
    %c0_2 = arith.constant 0 : index
    %1 = vector.load %arg5[%c0_1, %c0_2] : memref<1x128xf32, #tpu.memory_space<vmem>>, vector<1x128xf32>
    %c0_3 = arith.constant 0 : index
    %c0_4 = arith.constant 0 : index
    %c0_5 = arith.constant 0 : index
    %2 = vector.load %arg1[%c0_3, %c0_4, %c0_5] : memref<16x16x128xbf16, #tpu.memory_space<vmem>>, vector<16x16x128xbf16>
    %c0_6 = arith.constant 0 : index
    %c0_7 = arith.constant 0 : index
    %3 = vector.load %arg2[%c0_6, %c0_7] : memref<16x128xf32, #tpu.memory_space<vmem>>, vector<16x128xf32>
    %c0_8 = arith.constant 0 : index
    %c0_9 = arith.constant 0 : index
    %c0_10 = arith.constant 0 : index
    %4 = vector.load %arg3[%c0_8, %c0_9, %c0_10] : memref<16x16x1xf32, #tpu.memory_space<vmem>>, vector<16x16x1xf32>
    %5 = vector.shape_cast %2 : vector<16x16x128xbf16> to vector<256x128xbf16>
    %cst = arith.constant dense<0.000000e+00> : vector<256x128xf32>
    %6 = tpu.matmul %5, %0, %cst {dimension_numbers = #tpu.dot_dimension_numbers<[1], [0], [0], [1], [0, 0, 1, 1], [], []>} : vector<256x128xbf16>, vector<128x128xbf16>, vector<256x128xf32> -> vector<256x128xf32>
    %7 = vector.shape_cast %6 : vector<256x128xf32> to vector<16x16x128xf32>
    %8 = vector.shape_cast %3 : vector<16x128xf32> to vector<16x1x128xf32>
    %9 = vector.broadcast %8 : vector<16x1x128xf32> to vector<16x16x128xf32>
    %10 = arith.addf %7, %9 : vector<16x16x128xf32>
    %cst_11 = arith.constant 0.000000e+00 : f32
    %11 = vector.broadcast %cst_11 : f32 to vector<16x16x128xf32>
    %12 = arith.maximumf %10, %11 : vector<16x16x128xf32>
    %13 = vector.shape_cast %1 : vector<1x128xf32> to vector<1x1x128xf32>
    %14 = vector.broadcast %13 : vector<1x1x128xf32> to vector<16x16x128xf32>
    %15 = arith.mulf %12, %14 : vector<16x16x128xf32>
    %cst_12 = arith.constant dense<0.000000e+00> : vector<16x16xf32>
    %16 = vector.multi_reduction <add>, %15, %cst_12 [2] : vector<16x16x128xf32> to vector<16x16xf32>
    %17 = vector.shape_cast %16 : vector<16x16xf32> to vector<16x16x1xf32>
    %18 = arith.addf %17, %4 : vector<16x16x1xf32>
    %cst_13 = arith.constant dense<0xFF800000> : vector<16x1xf32>
    %19 = vector.multi_reduction <maximumf>, %18, %cst_13 [1] : vector<16x16x1xf32> to vector<16x1xf32>
    %20 = vector.shape_cast %19 : vector<16x1xf32> to vector<16x1x1xf32>
    %21 = vector.broadcast %20 : vector<16x1x1xf32> to vector<16x16x1xf32>
    %22 = arith.subf %18, %21 : vector<16x16x1xf32>
    %23 = math.exp %22 : vector<16x16x1xf32>
    %cst_14 = arith.constant dense<0.000000e+00> : vector<16x1xf32>
    %24 = vector.multi_reduction <add>, %23, %cst_14 [1] : vector<16x16x1xf32> to vector<16x1xf32>
    %25 = arith.extf %2 : vector<16x16x128xbf16> to vector<16x16x128xf32>
    %26 = vector.broadcast %23 : vector<16x16x1xf32> to vector<16x16x128xf32>
    %27 = arith.mulf %26, %25 : vector<16x16x128xf32>
    %cst_15 = arith.constant dense<0.000000e+00> : vector<16x128xf32>
    %28 = vector.multi_reduction <add>, %27, %cst_15 [1] : vector<16x16x128xf32> to vector<16x128xf32>
    %29 = tpu.reciprocal %24 {approx = true} : vector<16x1xf32> -> vector<16x1xf32>
    %30 = vector.broadcast %29 : vector<16x1xf32> to vector<16x128xf32>
    %31 = arith.mulf %28, %30 : vector<16x128xf32>
    %c0_16 = arith.constant 0 : index
    %c0_17 = arith.constant 0 : index
    %32 = vector.load %arg6[%c0_16, %c0_17] : memref<16x128xf32, #tpu.memory_space<vmem>>, vector<16x128xf32>
    tpu.vector_store %arg6[%c0_16, %c0_17], %31 {strides = array<i32>} : memref<16x128xf32, #tpu.memory_space<vmem>>, vector<16x128xf32>,
    return
  }
  func.func @transform_0(%arg0: i32) -> (i32, i32, i32) {
    %c0_i32 = arith.constant 0 : i32
    %c0_i32_0 = arith.constant 0 : i32
    %c0_i32_1 = arith.constant 0 : i32
    return %arg0, %c0_i32, %c0_i32_0 : i32, i32, i32
  }
  func.func @transform_1(%arg0: i32) -> (i32, i32) {
    %c0_i32 = arith.constant 0 : i32
    %c0_i32_0 = arith.constant 0 : i32
    return %arg0, %c0_i32 : i32, i32
  }
  func.func @transform_2(%arg0: i32) -> (i32, i32, i32) {
    %c0_i32 = arith.constant 0 : i32
    %c0_i32_0 = arith.constant 0 : i32
    %c0_i32_1 = arith.constant 0 : i32
    return %arg0, %c0_i32, %c0_i32_0 : i32, i32, i32
  }
  func.func @transform_3(%arg0: i32) -> (i32, i32) {
    %c0_i32 = arith.constant 0 : i32
    %c0_i32_0 = arith.constant 0 : i32
    %c0_i32_1 = arith.constant 0 : i32
    return %c0_i32, %c0_i32_0 : i32, i32
  }
  func.func @transform_4(%arg0: i32) -> (i32, i32) {
    %c0_i32 = arith.constant 0 : i32
    %c0_i32_0 = arith.constant 0 : i32
    %c0_i32_1 = arith.constant 0 : i32
    return %c0_i32, %c0_i32_0 : i32, i32
  }
  func.func @transform_5(%arg0: i32) -> (i32, i32) {
    %c0_i32 = arith.constant 0 : i32
    %c0_i32_0 = arith.constant 0 : i32
    return %arg0, %c0_i32 : i32, i32
  }
}

</mosaic_0001>

<bundles_post_ra>
// kernel: tpu_custom_call.1
= control target key start
LH: loop header
LB: loop body
LE: loop exit
PB: predicated region body
PF: predicated region fallthrough
CT: control target
= control target key end

     0   :  { %s2692_s0 = inlined_call_operand.vmem [shape: bf16[16,16,128], index: 0, kind: input, shape index: {}]   ;;  %s2693_s1 = inlined_call_operand.vmem [shape: f32[16,128], index: 1, kind: input, shape index: {}]   ;;  %s2694_s2 = inlined_call_operand.vmem [shape: f32[16,16,1], index: 2, kind: input, shape index: {}]   ;;  %s2695_s3 = inlined_call_operand.vmem [shape: bf16[128,128], index: 3, kind: input, shape index: {}]   ;;  %s2696_s4 = inlined_call_operand.vmem [shape: f32[1,128], index: 4, kind: input, shape index: {}]   ;;  %s2697_s5 = inlined_call_operand.hbm [shape: f32[16,128], index: 5, kind: output, shape index: {}]  }
   0x1   :  { %v1798_v0 = vld [vmem:[%s2695_s3] sm:$0xff]   ;;  %v1799_v1 = vld [vmem:[%s2695_s3 + $0x8] sm:$0xff]   ;;  %v1800_v2 = vld [vmem:[%s2695_s3 + $0x10] sm:$0xff]  }
   0x2   :  { %1727 = vmatprep.subr.bf16.mxu0 %v1798_v0  ;;  %1775 = vmatprep.subr.bf16.mxu1 %v1798_v0  ;;  %v1801_v3 = vld [vmem:[%s2695_s3 + $0x18] sm:$0xff]   ;;  %v39_v4 = vld [vmem:[%s2692_s0] sm:$0xff]  }
   0x3   :  { %1728 = vmatpush3.bf16.msra.mxu0 %v1798_v0  ;;  %1783 = vmatpush3.bf16.msra.mxu1 %v1798_v0  ;;  %v55_v5 = vld [vmem:[%s2692_s0 + $0x40] sm:$0xff]  }
   0x4   :  { %1729 = vmatprep.subr.bf16.mxu0 %v1799_v1  ;;  %1776 = vmatprep.subr.bf16.mxu1 %v1799_v1  ;;  %v1802_v6 = vld [vmem:[%s2695_s3 + $0x20] sm:$0xff]  }
   0x5   :  { %1743 = vmatprep.mubr.bf16.mxu0 %v39_v4  ;;  %1759 = vmatprep.mubr.bf16.mxu1 %v55_v5 }
   0x7   :  { %1730 = vmatpush3.bf16.msra.mxu0 %v1799_v1  ;;  %1784 = vmatpush3.bf16.msra.mxu1 %v1799_v1 }
   0x8   :  { %1731 = vmatprep.subr.bf16.mxu0 %v1800_v2  ;;  %1777 = vmatprep.subr.bf16.mxu1 %v1800_v2 }
   0xb   :  { %1732 = vmatpush3.bf16.msra.mxu0 %v1800_v2  ;;  %1785 = vmatpush3.bf16.msra.mxu1 %v1800_v2 }
   0xc   :  { %1733 = vmatprep.subr.bf16.mxu0 %v1801_v3  ;;  %1778 = vmatprep.subr.bf16.mxu1 %v1801_v3 }
   0xd   :  { %10 = vsyncpa [#allocation3], 0  ;;  %v1803_v7 = vld [vmem:[%s2695_s3 + $0x28] sm:$0xff]   ;;  %v1804_v8 = vld [vmem:[%s2695_s3 + $0x30] sm:$0xff]   ;;  %v1976_v24 = vmov 1966171168   ;;  %v416_v26 = vlaneseq }
   0xe   :  { %v1805_v9 = vld [vmem:[%s2695_s3 + $0x38] sm:$0xff]   ;;  %v41_v10 = vld [vmem:[%s2692_s0 + $0x8] sm:$0xff]   ;;  %v43_v12 = vld [vmem:[%s2692_s0 + $0x10] sm:$0xff]   ;;  %v414_v25 = vunpack.c.l.s4 %v1976_v24  ;;  %vm788_vm0 = vcmask 7168   ;;  %vm1637_vm1 = vcmask 1041409   ;;  %vm1639_vm2 = vcmask 1042434  }
   0xf   :  { %1734 = vmatpush3.bf16.msra.mxu0 %v1801_v3  ;;  %1786 = vmatpush3.bf16.msra.mxu1 %v1801_v3  ;;  %v57_v11 = vld [vmem:[%s2692_s0 + $0x48] sm:$0xff]   ;;  %v59_v13 = vld [vmem:[%s2692_s0 + $0x50] sm:$0xff]   ;;  %v45_v14 = vld [vmem:[%s2692_s0 + $0x18] sm:$0xff]   ;;  %v417_v28 = vshrl.u32 %v416_v26, 7  ;;  %vm1641_vm3 = vcmask 1043459   ;;  %vm1643_vm4 = vcmask 1044484  }
  0x10   :  { %1735 = vmatprep.subr.bf16.mxu0 %v1802_v6  ;;  %1779 = vmatprep.subr.bf16.mxu1 %v1802_v6  ;;  %v61_v15 = vld [vmem:[%s2692_s0 + $0x58] sm:$0xff]   ;;  %v47_v16 = vld [vmem:[%s2692_s0 + $0x20] sm:$0xff]   ;;  %v49_v18 = vld [vmem:[%s2692_s0 + $0x28] sm:$0xff]   ;;  %v415_v27 = vunpack.c.0.s8 %v414_v25  ;;  %vm1645_vm5 = vcmask 1045509   ;;  %vm1647_vm6 = vcmask 1046534   ;;  %vm1649_vm7 = vcmask 1047559  }
  0x11   :  { %v63_v17 = vld [vmem:[%s2692_s0 + $0x60] sm:$0xff]   ;;  %v65_v19 = vld [vmem:[%s2692_s0 + $0x68] sm:$0xff]   ;;  %v51_v20 = vld [vmem:[%s2692_s0 + $0x30] sm:$0xff]   ;;  %v2097_v37 = vsub.s32 0, %v417_v28 }
  0x12   :  { %v67_v21 = vld [vmem:[%s2692_s0 + $0x70] sm:$0xff]   ;;  %v53_v22 = vld [vmem:[%s2692_s0 + $0x38] sm:$0xff]   ;;  %v2083_v29 = vsub.s32 %v415_v27, %v417_v28  ;;  %v71_v30 = vld [vmem:[%s2693_s1] sm:$0xff] }
  0x13   :  { %1736 = vmatpush3.bf16.msra.mxu0 %v1802_v6  ;;  %1787 = vmatpush3.bf16.msra.mxu1 %v1802_v6  ;;  %v69_v23 = vld [vmem:[%s2692_s0 + $0x78] sm:$0xff]   ;;  %v2091_v31 = vld [vmem:[%s2693_s1 + $0x8] sm:$0xff]  ;;  %v2115_v54 = vld [vmem:[%s2696_s4] ss:$0 sm:$0xff]  ;;  %v412_v3 = vcombine.high %v71_v30, %v71_v30 }
  0x14   :  { %1737 = vmatprep.subr.bf16.mxu0 %v1803_v7  ;;  %1780 = vmatprep.subr.bf16.mxu1 %v1803_v7  ;;  %v419_v32 = vrot.slane %v71_v30, %v2083_v29  ;;  %v468_v33 = vrot.slane %v2091_v31, %v2083_v29 }
  0x16   :  { %v427_v34 = vcombine.high %v419_v32, %v419_v32  ;;  %v476_v35 = vcombine.high %v468_v33, %v468_v33  ;;  %v2101_v39 = vrot.slane %v419_v32, %v2083_v29  ;;  %v2104_v40 = vrot.slane %v468_v33, %v2083_v29 }
  0x17   :  { %1738 = vmatpush3.bf16.msra.mxu0 %v1803_v7  ;;  %1788 = vmatpush3.bf16.msra.mxu1 %v1803_v7 }
  0x18   :  { %1739 = vmatprep.subr.bf16.mxu0 %v1804_v8  ;;  %1781 = vmatprep.subr.bf16.mxu1 %v1804_v8  ;;  %v449_v36 = vrot.slane %v427_v34, %v2083_v29  ;;  %v498_v38 = vrot.slane %v476_v35, %v2083_v29  ;;  %v513_v43 = vrot.slane %v2101_v39, %v2097_v37 }
  0x19   :  { %v545_v46 = vrot.slane %v2104_v40, %v2097_v37  ;;  %v457_v25 = vcombine.high %v2101_v39, %v2101_v39 }
  0x1a   :  { %v517_v41 = vrot.slane %v449_v36, %v2097_v37  ;;  %v549_v42 = vrot.slane %v498_v38, %v2097_v37  ;;  %v459_v60 = vcombine.high %v449_v36, %v449_v36  ;;  %v508_v5 = vcombine.high %v498_v38, %v498_v38 }
  0x1b   :  { %1740 = vmatpush3.bf16.msra.mxu0 %v1804_v8  ;;  %1789 = vmatpush3.bf16.msra.mxu1 %v1804_v8 }
  0x1c   :  { %1741 = vmatprep.subr.bf16.mxu0 %v1805_v9  ;;  %1782 = vmatprep.subr.bf16.mxu1 %v1805_v9  ;;  %v525_v4 = vrot.slane %v459_v60, %v2097_v37 }
  0x1f   :  { %1742 = vmatpush3.bf16.msra.mxu0 %v1805_v9  ;;  %1790 = vmatpush3.bf16.msra.mxu1 %v1805_v9 }
  0x22   :  { %1744 = vmatmul.mubr.bf16.vlgmr.msra.gmra.mrb[0].mxu0 %v41_v10  ;;  %1760 = vmatmul.mubr.bf16.vlgmr.msra.gmra.mrb[0].mxu1 %v57_v11 }
  0x23   :  { %1747 = vmatprep.mubr.bf16.mxu0 %v43_v12  ;;  %1763 = vmatprep.mubr.bf16.mxu1 %v59_v13 }
  0x2a   :  { %1748 = vmatmul.mubr.bf16.gmra.mrb[4].mxu0 %v45_v14  ;;  %1764 = vmatmul.mubr.bf16.gmra.mrb[4].mxu1 %v61_v15 }
  0x2b   :  { %1751 = vmatprep.mubr.bf16.mxu0 %v47_v16  ;;  %1767 = vmatprep.mubr.bf16.mxu1 %v63_v17 }
  0x32   :  { %1752 = vmatmul.mubr.bf16.gmra.mrb[8].mxu0 %v49_v18  ;;  %1768 = vmatmul.mubr.bf16.gmra.mrb[8].mxu1 %v65_v19  ;;  %v426_v18 = vrot.slane %v412_v3, %v2083_v29  ;;  %v461_v19 = vcombine.high %v2091_v31, %v2091_v31  ;;  %v506_v31 = vcombine.high %v2104_v40, %v2104_v40 }
  0x33   :  { %1755 = vmatprep.mubr.bf16.mxu0 %v51_v20  ;;  %1771 = vmatprep.mubr.bf16.mxu1 %v67_v21 }
  0x34   :  { %v428_v32 = vcombine.high %v426_v18, %v426_v18  ;;  %v475_v33 = vrot.slane %v461_v19, %v2083_v29  ;;  %v553_v40 = vrot.slane %v506_v31, %v2097_v37 }
  0x3a   :  { %1756 = vmatmul.mubr.bf16.gmra.mrb[12].mxu0 %v53_v22  ;;  %1772 = vmatmul.mubr.bf16.gmra.mrb[12].mxu1 %v69_v23  ;;  %v557_v22 = vrot.slane %v508_v5, %v2097_v37 }
  0xf5   :  { %v1745_v44 = vpop.f32.mrb[0].mxu0  ;;  %v1761_v45 = vpop.f32.mrb[0].mxu1 }
  0xf6   :  { %v592_v47 = vadd.f32 %v1745_v44, %v517_v41  ;;  %v608_v48 = vadd.f32 %v1761_v45, %v549_v42  ;;  %v283_v49 = vpop.f32.mrb[1].mxu0  ;;  %v347_v50 = vpop.f32.mrb[1].mxu1 }
  0xf7   :  { %v590_v51 = vadd.f32 %v513_v43, %v283_v49  ;;  %v1746_v52 = vpop.f32.mrb[2].mxu0  ;;  %v1762_v53 = vpop.f32.mrb[2].mxu1  ;;  %v606_v61 = vadd.f32 %v545_v46, %v347_v50  ;;  %v477_v49 = vcombine.high %v475_v33, %v475_v33 }
  0xf8   :  { %v624_v55 = vmax.f32 %v592_v47, 0.0  ;;  %v640_v56 = vmax.f32 %v608_v48, 0.0  ;;  %v593_v57 = vadd.f32 %v1746_v52, %v517_v41  ;;  %v286_v58 = vpop.f32.mrb[3].mxu0  ;;  %v350_v59 = vpop.f32.mrb[3].mxu1  ;;  %v609_v62 = vadd.f32 %v1762_v53, %v549_v42 }
  0xf9   :  { %v622_v63 = vmax.f32 %v590_v51, 0.0  ;;  %v638_v6 = vmax.f32 %v606_v61, 0.0  ;;  %v591_v7 = vadd.f32 %v513_v43, %v286_v58  ;;  %v607_v11 = vadd.f32 %v545_v46, %v350_v59 }
  0xfa   :  { %v625_v0 = vmax.f32 %v593_v57, 0.0  ;;  %v678_v1 = vmul.f32 %v2115_v54, %v640_v56  ;;  %v662_v2 = vmul.f32 %v2115_v54, %v624_v55  ;;  %v641_v10 = vmax.f32 %v609_v62, 0.0 }
  0xfb   :  { %v660_v12 = vmul.f32 %v2115_v54, %v622_v63  ;;  %v623_v26 = vmax.f32 %v591_v7, 0.0  ;;  %v639_v27 = vmax.f32 %v607_v11, 0.0  ;;  %v676_v28 = vmul.f32 %v2115_v54, %v638_v6 }
  0xfc   :  { %728 = vadd.xlane.f32.xlu0 %v678_v1  ;;  %696 = vadd.xlane.f32.xlu1 %v662_v2  ;;  %v663_v13 = vmul.f32 %v2115_v54, %v625_v0  ;;  %v679_v30 = vmul.f32 %v2115_v54, %v641_v10  ;;  %v521_v42 = vrot.slane %v457_v25, %v2097_v37 }
  0xfd   :  { %v1749_v8 = vpop.f32.mrb[4].mxu0  ;;  %v1765_v9 = vpop.f32.mrb[4].mxu1  ;;  %v677_v43 = vmul.f32 %v2115_v54, %v639_v27  ;;  %v661_v44 = vmul.f32 %v2115_v54, %v623_v26  ;;  %v2140_v47 = vrot.slane %v428_v32, %v2083_v29  ;;  %v505_v62 = vrot.slane %v477_v49, %v2083_v29 }
  0xfe   :  { %v299_v14 = vpop.f32.mrb[5].mxu0  ;;  %v363_v15 = vpop.f32.mrb[5].mxu1  ;;  %v596_v20 = vadd.f32 %v1749_v8, %v525_v4  ;;  %v612_v36 = vadd.f32 %v1765_v9, %v557_v22  ;;  %v442_v9 = vrot.slane %v426_v18, %v2083_v29  ;;  %v491_v18 = vrot.slane %v475_v33, %v2083_v29 }
  0xff   :  { %v1750_v16 = vpop.f32.mrb[6].mxu0  ;;  %v1766_v17 = vpop.f32.mrb[6].mxu1  ;;  %v594_v58 = vadd.f32 %v521_v42, %v299_v14  ;;  %v610_v60 = vadd.f32 %v553_v40, %v363_v15  ;;  %v533_v61 = vrot.slane %v2140_v47, %v2097_v37  ;;  %v565_v10 = vrot.slane %v505_v62, %v2097_v37 }
 0x100   :  { %692 = vadd.xlane.f32.xlu0 %v660_v12  ;;  %698 = vadd.xlane.f32.xlu1 %v663_v13  ;;  %v597_v21 = vadd.f32 %v1750_v16, %v525_v4  ;;  %v302_v23 = vpop.f32.mrb[7].mxu0  ;;  %v366_v24 = vpop.f32.mrb[7].mxu1  ;;  %v628_v34 = vmax.f32 %v596_v20, 0.0  ;;  %v613_v38 = vadd.f32 %v1766_v17, %v557_v22  ;;  %v644_v51 = vmax.f32 %v612_v36, 0.0 }
 0x101   :  { %v595_v59 = vadd.f32 %v521_v42, %v302_v23  ;;  %v611_v1 = vadd.f32 %v553_v40, %v366_v24  ;;  %v626_v4 = vmax.f32 %v594_v58, 0.0  ;;  %v642_v8 = vmax.f32 %v610_v60, 0.0 }
 0x102   :  { %v629_v35 = vmax.f32 %v597_v21, 0.0  ;;  %v645_v52 = vmax.f32 %v613_v38, 0.0  ;;  %v666_v53 = vmul.f32 %v2115_v54, %v628_v34  ;;  %v682_v63 = vmul.f32 %v2115_v54, %v644_v51 }
 0x103   :  { %v627_v5 = vmax.f32 %v595_v59, 0.0  ;;  %v643_v13 = vmax.f32 %v611_v1, 0.0  ;;  %v664_v19 = vmul.f32 %v2115_v54, %v626_v4  ;;  %v529_v21 = vrot.slane %v442_v9, %v2097_v37 }
 0x104   :  { %724 = vadd.xlane.f32.xlu0 %v676_v28  ;;  %730 = vadd.xlane.f32.xlu1 %v679_v30  ;;  %v667_v55 = vmul.f32 %v2115_v54, %v629_v35  ;;  %v683_v0 = vmul.f32 %v2115_v54, %v645_v52  ;;  %v680_v23 = vmul.f32 %v2115_v54, %v642_v8 }
 0x105   :  { %v1753_v41 = vpop.f32.mrb[8].mxu0  ;;  %v1769_v39 = vpop.f32.mrb[8].mxu1  ;;  %v665_v20 = vmul.f32 %v2115_v54, %v627_v5  ;;  %v681_v26 = vmul.f32 %v2115_v54, %v643_v13  ;;  %v460_v28 = vcombine.high %v2140_v47, %v2140_v47  ;;  %v561_v32 = vrot.slane %v491_v18, %v2097_v37 }
 0x106   :  { %v315_v45 = vpop.f32.mrb[9].mxu0  ;;  %v2136_v46 = vpop.f32.mrb[9].mxu1  ;;  %v600_v14 = vadd.f32 %v1753_v41, %v533_v61  ;;  %v616_v22 = vadd.f32 %v1769_v39, %v565_v10  ;;  %v458_v39 = vcombine.high %v442_v9, %v442_v9  ;;  %v509_v42 = vcombine.high %v505_v62, %v505_v62 }
 0x107   :  { %v1754_v48 = vpop.f32.mrb[10].mxu0  ;;  %v1770_v50 = vpop.f32.mrb[10].mxu1  ;;  %v598_v30 = vadd.f32 %v529_v21, %v315_v45  ;;  %v541_v36 = vrot.slane %v460_v28, %v2097_v37  ;;  %v614_v41 = vadd.f32 %v561_v32, %v2136_v46  ;;  %v507_v47 = vcombine.high %v491_v18, %v491_v18 }
 0x108   :  { %726 = vadd.xlane.f32.xlu1 %v677_v43  ;;  %694 = vadd.xlane.f32.xlu0 %v661_v44  ;;  %v318_v56 = vpop.f32.mrb[11].mxu0  ;;  %v382_v57 = vpop.f32.mrb[11].mxu1  ;;  %v601_v15 = vadd.f32 %v1754_v48, %v533_v61  ;;  %v632_v24 = vmax.f32 %v600_v14, 0.0  ;;  %v617_v27 = vadd.f32 %v1770_v50, %v565_v10  ;;  %v648_v31 = vmax.f32 %v616_v22, 0.0 }
 0x109   :  { %v599_v35 = vadd.f32 %v529_v21, %v318_v56  ;;  %v630_v38 = vmax.f32 %v598_v30, 0.0  ;;  %v615_v40 = vadd.f32 %v561_v32, %v382_v57  ;;  %v646_v48 = vmax.f32 %v614_v41, 0.0  ;;  %v76_v21 = vld [vmem:[%s2694_s2 + $0x18] sm:$0xff]  ;;  %v73_v30 = vld [vmem:[%s2694_s2] sm:$0xff] }
 0x10a   :  { %v633_v25 = vmax.f32 %v601_v15, 0.0  ;;  %v649_v34 = vmax.f32 %v617_v27, 0.0  ;;  %v670_v29 = vmul.f32 %v2115_v54, %v632_v24  ;;  %v686_v44 = vmul.f32 %v2115_v54, %v648_v31  ;;  %v89_v32 = vld [vmem:[%s2694_s2 + $0x80] sm:$0xff] }
 0x10b   :  { %v631_v43 = vmax.f32 %v599_v35, 0.0  ;;  %v668_v49 = vmul.f32 %v2115_v54, %v630_v38  ;;  %v537_v50 = vrot.slane %v458_v39, %v2097_v37  ;;  %v573_v51 = vrot.slane %v509_v42, %v2097_v37  ;;  %v74_v38 = vld [vmem:[%s2694_s2 + $0x8] sm:$0xff] }
 0x10c   :  { %704 = vadd.xlane.f32.xlu0 %v666_v53  ;;  %706 = vadd.xlane.f32.xlu1 %v667_v55  ;;  %v671_v33 = vmul.f32 %v2115_v54, %v633_v25  ;;  %v687_v45 = vmul.f32 %v2115_v54, %v649_v34  ;;  %v647_v46 = vmax.f32 %v615_v40, 0.0  ;;  %v569_v58 = vrot.slane %v507_v47, %v2097_v37  ;;  %v92_v25 = vld [vmem:[%s2694_s2 + $0x98] sm:$0xff] }
 0x10d   :  { %v1757_v2 = vpop.f32.mrb[12].mxu0  ;;  %v2149_v3 = vpop.f32.mrb[12].mxu1  ;;  %v669_v53 = vmul.f32 %v2115_v54, %v631_v43  ;;  %v684_v57 = vmul.f32 %v2115_v54, %v646_v48 }
 0x10e   :  { %v331_v6 = vpop.f32.mrb[13].mxu0  ;;  %v2151_v7 = vpop.f32.mrb[13].mxu1  ;;  %v604_v52 = vadd.f32 %v1757_v2, %v541_v36  ;;  %v685_v61 = vmul.f32 %v2115_v54, %v647_v46  ;;  %v620_v5 = vadd.f32 %v2149_v3, %v573_v51  ;;  %v79_v46 = vld [vmem:[%s2694_s2 + $0x30] sm:$0xff] }
 0x10f   :  { %v1758_v11 = vpop.f32.mrb[14].mxu0  ;;  %v1774_v12 = vpop.f32.mrb[14].mxu1  ;;  %v602_v56 = vadd.f32 %v537_v50, %v331_v6 }
 0x110   :  { %736 = vadd.xlane.f32.xlu0 %v682_v63  ;;  %738 = vadd.xlane.f32.xlu1 %v683_v0  ;;  %v334_v16 = vpop.f32.mrb[15].mxu0  ;;  %v2155_v17 = vpop.f32.mrb[15].mxu1  ;;  %v605_v55 = vadd.f32 %v1758_v11, %v541_v36  ;;  %v636_v59 = vmax.f32 %v604_v52, 0.0  ;;  %v621_v62 = vadd.f32 %v1774_v12, %v573_v51  ;;  %v618_v0 = vadd.f32 %v569_v58, %v2151_v7  ;;  %v90_v36 = vld [vmem:[%s2694_s2 + $0x88] sm:$0xff]  ;;  %v80_v52 = vld [vmem:[%s2694_s2 + $0x38] sm:$0xff] }
 0x111   :  { %v634_v63 = vmax.f32 %v602_v56, 0.0  ;;  %v603_v37 = vadd.f32 %v537_v50, %v334_v16  ;;  %v619_v7 = vadd.f32 %v569_v58, %v2155_v17  ;;  %v652_v11 = vmax.f32 %v620_v5, 0.0 }
 0x112   :  { %v637_v60 = vmax.f32 %v605_v55, 0.0  ;;  %v653_v1 = vmax.f32 %v621_v62, 0.0  ;;  %v674_v2 = vmul.f32 %v2115_v54, %v636_v59  ;;  %v650_v6 = vmax.f32 %v618_v0, 0.0 }
 0x113   :  { %v635_v8 = vmax.f32 %v603_v37, 0.0  ;;  %v672_v9 = vmul.f32 %v2115_v54, %v634_v63  ;;  %v651_v12 = vmax.f32 %v619_v7, 0.0  ;;  %v690_v3 = vmul.f32 %v2115_v54, %v652_v11 }
 0x114   :  { %700 = vadd.xlane.f32.xlu0 %v664_v19  ;;  %702 = vadd.xlane.f32.xlu1 %v665_v20  ;;  %v675_v4 = vmul.f32 %v2115_v54, %v637_v60  ;;  %v691_v10 = vmul.f32 %v2115_v54, %v653_v1  ;;  %v688_v13 = vmul.f32 %v2115_v54, %v650_v6  ;;  %v1977_v16 = vmov 0   ;;  %v75_v19 = vld [vmem:[%s2694_s2 + $0x10] sm:$0xff] }
 0x115   :  { %v673_v14 = vmul.f32 %v2115_v54, %v635_v8  ;;  %v689_v15 = vmul.f32 %v2115_v54, %v651_v12  ;;  %1796 = vset.pattern.permute.xlu1 %v1977_v16  ;;  %1797 = vset.pattern.permute.xlu0 %v1977_v16  ;;  %v91_v54 = vld [vmem:[%s2694_s2 + $0x90] sm:$0xff]  ;;  %v96_v8 = vld [vmem:[%s2694_s2 + $0xb8] sm:$0xff] }
 0x116   :  { %v95_v6 = vld [vmem:[%s2694_s2 + $0xb0] sm:$0xff] }
 0x118   :  { %732 = vadd.xlane.f32.xlu0 %v680_v23  ;;  %734 = vadd.xlane.f32.xlu1 %v681_v26 }
 0x11c   :  { %712 = vadd.xlane.f32.xlu0 %v670_v29  ;;  %714 = vadd.xlane.f32.xlu1 %v671_v33 }
 0x120   :  { %744 = vadd.xlane.f32.xlu0 %v686_v44  ;;  %746 = vadd.xlane.f32.xlu1 %v687_v45 }
 0x124   :  { %708 = vadd.xlane.f32.xlu0 %v668_v49  ;;  %710 = vadd.xlane.f32.xlu1 %v669_v53 }
 0x128   :  { %740 = vadd.xlane.f32.xlu0 %v684_v57  ;;  %742 = vadd.xlane.f32.xlu1 %v685_v61 }
 0x12c   :  { %720 = vadd.xlane.f32.xlu0 %v674_v2  ;;  %722 = vadd.xlane.f32.xlu1 %v675_v4 }
 0x130   :  { %716 = vadd.xlane.f32.xlu0 %v672_v9  ;;  %754 = vadd.xlane.f32.xlu1 %v691_v10 }
 0x134   :  { %748 = vadd.xlane.f32.xlu0 %v688_v13  ;;  %718 = vadd.xlane.f32.xlu1 %v673_v14 }
 0x138   :  { %752 = vadd.xlane.f32.xlu0 %v690_v3  ;;  %750 = vadd.xlane.f32.xlu1 %v689_v15 }
 0x189   :  { %v729_v17 = vpop.xlane.xlu0 %728  ;;  %v697_v20 = vpop.xlane.xlu1 %696 }
 0x18a   :  { %v2196_v22 = vadd.f32 %v697_v20, %v75_v19  ;;  %v2206_v26 = vadd.f32 %v729_v17, %v91_v54 }
 0x18c   :  { %v798_v27 = vsel %vm788_vm0, %v2196_v22, -inf  ;;  %v870_v41 = vsel %vm788_vm0, %v2206_v26, -inf }
 0x18d   :  { %v693_v18 = vpop.xlane.xlu0 %692  ;;  %v699_v23 = vpop.xlane.xlu1 %698 }
 0x18e   :  { %v2201_v24 = vadd.f32 %v699_v23, %v76_v21  ;;  %v2228_v39 = vadd.f32 %v693_v18, %v73_v30  ;;  %v77_v18 = vld [vmem:[%s2694_s2 + $0x20] sm:$0xff] }
 0x190   :  { %v799_v28 = vsel %vm788_vm0, %v2201_v24, -inf  ;;  %v789_v53 = vsel %vm788_vm0, %v2228_v39, -inf }
 0x191   :  { %v800_v31 = vmax.f32 %v798_v27, %v799_v28  ;;  %v725_v34 = vpop.xlane.xlu0 %724  ;;  %v731_v29 = vpop.xlane.xlu1 %730 }
 0x192   :  { %v2218_v33 = vadd.f32 %v731_v29, %v92_v25  ;;  %v2230_v42 = vadd.f32 %v725_v34, %v89_v32 }
 0x193   :  { %v801_v35 = vrot.slane %v800_v31, 4 }
 0x194   :  { %v871_v43 = vsel %vm788_vm0, %v2218_v33, -inf  ;;  %v861_v55 = vsel %vm788_vm0, %v2230_v42, -inf }
 0x195   :  { %v802_v44 = vmax.f32 %v800_v31, %v801_v35  ;;  %v872_v45 = vmax.f32 %v870_v41, %v871_v43  ;;  %v727_v40 = vpop.xlane.xlu1 %726  ;;  %v695_v47 = vpop.xlane.xlu0 %694 }
 0x196   :  { %v2234_v48 = vadd.f32 %v727_v40, %v90_v36  ;;  %v2236_v49 = vadd.f32 %v695_v47, %v74_v38 }
 0x197   :  { %v803_v50 = vrot.slane %v802_v44, 2  ;;  %v873_v51 = vrot.slane %v872_v45, 4 }
 0x198   :  { %v862_v56 = vsel %vm788_vm0, %v2234_v48, -inf  ;;  %v790_v58 = vsel %vm788_vm0, %v2236_v49, -inf }
 0x199   :  { %v804_v57 = vmax.f32 %v802_v44, %v803_v50  ;;  %v874_v59 = vmax.f32 %v872_v45, %v873_v51  ;;  %v863_v60 = vmax.f32 %v861_v55, %v862_v56  ;;  %v791_v61 = vmax.f32 %v789_v53, %v790_v58  ;;  %v705_v62 = vpop.xlane.xlu0 %704  ;;  %v707_v63 = vpop.xlane.xlu1 %706  ;;  %v78_v45 = vld [vmem:[%s2694_s2 + $0x28] sm:$0xff]  ;;  %v93_v51 = vld [vmem:[%s2694_s2 + $0xa0] sm:$0xff] }
 0x19a   :  { %v2252_v0 = vadd.f32 %v705_v62, %v79_v46  ;;  %v2254_v1 = vadd.f32 %v707_v63, %v80_v52 }
 0x19b   :  { %v805_v2 = vrot.slane %v804_v57, 1  ;;  %v875_v4 = vrot.slane %v874_v59, 2  ;;  %v864_v37 = vrot.slane %v863_v60, 4  ;;  %v792_v5 = vrot.slane %v791_v61, 4 }
 0x19c   :  { %v816_v9 = vsel %vm788_vm0, %v2252_v0, -inf  ;;  %v817_v10 = vsel %vm788_vm0, %v2254_v1, -inf }
 0x19d   :  { %v806_v7 = vmax.f32 %v804_v57, %v805_v2  ;;  %v876_v11 = vmax.f32 %v874_v59, %v875_v4  ;;  %v865_v12 = vmax.f32 %v863_v60, %v864_v37  ;;  %v793_v13 = vmax.f32 %v791_v61, %v792_v5  ;;  %v737_v14 = vpop.xlane.xlu0 %736  ;;  %v739_v3 = vpop.xlane.xlu1 %738  ;;  %v94_v37 = vld [vmem:[%s2694_s2 + $0xa8] sm:$0xff] }
 0x19e   :  { %v818_v15 = vmax.f32 %v816_v9, %v817_v10  ;;  %v2266_v16 = vadd.f32 %v737_v14, %v95_v6  ;;  %v2268_v17 = vadd.f32 %v739_v3, %v96_v8 }
 0x19f   :  { %v935_v19 = vsub.f32 %v2196_v22, %v806_v7  ;;  %v936_v20 = vsub.f32 %v2201_v24, %v806_v7  ;;  %v877_v21 = vrot.slane %v876_v11, 1  ;;  %v866_v54 = vrot.slane %v865_v12, 2 }
 0x1a0   :  { %v794_v23 = vrot.slane %v793_v13, 2  ;;  %v819_v25 = vrot.slane %v818_v15, 4  ;;  %v888_v27 = vsel %vm788_vm0, %v2266_v16, -inf  ;;  %v889_v28 = vsel %vm788_vm0, %v2268_v17, -inf }
 0x1a1   :  { %v969_v30 = vmul.f32 1.442695, %v935_v19  ;;  %v971_v31 = vmul.f32 1.442695, %v936_v20  ;;  %v878_v32 = vmax.f32 %v876_v11, %v877_v21  ;;  %v867_v22 = vmax.f32 %v865_v12, %v866_v54  ;;  %v701_v34 = vpop.xlane.xlu0 %700  ;;  %v703_v24 = vpop.xlane.xlu1 %702  ;;  %v83_v19 = vld [vmem:[%s2694_s2 + $0x50] sm:$0xff]  ;;  %v84_v21 = vld [vmem:[%s2694_s2 + $0x58] sm:$0xff] }
 0x1a2   :  { %v795_v29 = vmax.f32 %v793_v13, %v794_v23  ;;  %v820_v35 = vmax.f32 %v818_v15, %v819_v25  ;;  %v890_v36 = vmax.f32 %v888_v27, %v889_v28  ;;  %v2279_v38 = vadd.f32 %v701_v34, %v77_v18 }
 0x1a3   :  { %1840 = vpow2.f32 %v969_v30  ;;  %v951_v41 = vsub.f32 %v2206_v26, %v878_v32  ;;  %v952_v43 = vsub.f32 %v2218_v33, %v878_v32  ;;  %v868_v44 = vrot.slane %v867_v22, 1 }
 0x1a4   :  { %1842 = vpow2.f32 %v971_v31  ;;  %v796_v40 = vrot.slane %v795_v29, 1  ;;  %v821_v47 = vrot.slane %v820_v35, 2  ;;  %v891_v50 = vrot.slane %v890_v36, 4 }
 0x1a5   :  { %v1001_v46 = vmul.f32 1.442695, %v951_v41  ;;  %v1003_v52 = vmul.f32 1.442695, %v952_v43  ;;  %v869_v53 = vmax.f32 %v867_v22, %v868_v44  ;;  %v807_v26 = vsel %vm788_vm0, %v2279_v38, -inf  ;;  %v733_v33 = vpop.xlane.xlu0 %732  ;;  %v735_v62 = vpop.xlane.xlu1 %734 }
 0x1a6   :  { %v797_v55 = vmax.f32 %v795_v29, %v796_v40  ;;  %v822_v56 = vmax.f32 %v820_v35, %v821_v47  ;;  %v892_v58 = vmax.f32 %v890_v36, %v891_v50  ;;  %v2291_v57 = vadd.f32 %v703_v24, %v78_v45 }
 0x1a7   :  { %1844 = vpow2.f32 %v1001_v46  ;;  %v949_v59 = vsub.f32 %v2230_v42, %v869_v53  ;;  %v950_v60 = vsub.f32 %v2234_v48, %v869_v53  ;;  %v2295_v61 = vadd.f32 %v733_v33, %v93_v51 }
 0x1a8   :  { %1846 = vpow2.f32 %v1003_v52  ;;  %v933_v63 = vsub.f32 %v2228_v39, %v797_v55  ;;  %v934_v2 = vsub.f32 %v2236_v49, %v797_v55  ;;  %v823_v4 = vrot.slane %v822_v56, 1 }
 0x1a9   :  { %v997_v5 = vmul.f32 1.442695, %v949_v59  ;;  %v999_v6 = vmul.f32 1.442695, %v950_v60  ;;  %v893_v8 = vrot.slane %v892_v58, 2  ;;  %v808_v42 = vsel %vm788_vm0, %v2291_v57, -inf  ;;  %v713_v20 = vpop.xlane.xlu0 %712  ;;  %v715_v54 = vpop.xlane.xlu1 %714 }
 0x1aa   :  { %v965_v48 = vmul.f32 1.442695, %v933_v63  ;;  %v967_v9 = vmul.f32 1.442695, %v934_v2  ;;  %v824_v10 = vmax.f32 %v822_v56, %v823_v4  ;;  %v809_v7 = vmax.f32 %v807_v26, %v808_v42 }
 0x1ab   :  { %1848 = vpow2.f32 %v997_v5  ;;  %v894_v11 = vmax.f32 %v892_v58, %v893_v8  ;;  %v2304_v39 = vadd.f32 %v735_v62, %v94_v37  ;;  %v879_v12 = vsel %vm788_vm0, %v2295_v61, -inf }
 0x1ac   :  { %1850 = vpow2.f32 %v999_v6  ;;  %v810_v49 = vrot.slane %v809_v7, 4  ;;  %v939_v14 = vsub.f32 %v2252_v0, %v824_v10  ;;  %v2321_v31 = vadd.f32 %v713_v20, %v83_v19 }
 0x1ad   :  { %v1841_v13 = vpop.eup %1840  ;;  %1852 = vpow2.f32 %v965_v48  ;;  %v895_v3 = vrot.slane %v894_v11, 1  ;;  %v880_v15 = vsel %vm788_vm0, %v2304_v39, -inf  ;;  %v2323_v32 = vadd.f32 %v715_v54, %v84_v21  ;;  %v745_v62 = vpop.xlane.xlu0 %744 }
 0x1ae   :  { %v1843_v18 = vpop.eup %1842  ;;  %v1038_v23 = vsel %vm788_vm0, %v1841_v13, 0.0  ;;  %1854 = vpow2.f32 %v967_v9  ;;  %1217 = vperm.xlu1 %1796, %v1841_v13   ;;  %v811_v27 = vmax.f32 %v809_v7, %v810_v49  ;;  %v881_v28 = vmax.f32 %v879_v12, %v880_v15  ;;  %v747_v6 = vpop.xlane.xlu1 %746  ;;  %v100_v12 = vld [vmem:[%s2694_s2 + $0xd8] sm:$0xff] }
 0x1af   :  { %v1039_v0 = vsel %vm788_vm0, %v1843_v18, 0.0  ;;  %v896_v25 = vmax.f32 %v894_v11, %v895_v3  ;;  %v977_v34 = vmul.f32 1.442695, %v939_v14  ;;  %v940_v41 = vsub.f32 %v2254_v1, %v824_v10  ;;  %v99_v10 = vld [vmem:[%s2694_s2 + $0xd0] sm:$0xff] }
 0x1b0   :  { %v2319_v30 = vadd.f32 %v1039_v0, %v1038_v23  ;;  %v812_v29 = vrot.slane %v811_v27, 2  ;;  %v882_v43 = vrot.slane %v881_v28, 4  ;;  %v834_v51 = vsel %vm788_vm0, %v2321_v31, -inf }
 0x1b1   :  { %v1845_v22 = vpop.eup %1844  ;;  %v956_v24 = vsub.f32 %v2268_v17, %v896_v25  ;;  %v835_v17 = vsel %vm788_vm0, %v2323_v32, -inf  ;;  %1856 = vpow2.f32 %v977_v34  ;;  %v979_v26 = vmul.f32 1.442695, %v940_v41  ;;  %v709_v11 = vpop.xlane.xlu0 %708 }
 0x1b2   :  { %v1847_v35 = vpop.eup %1846  ;;  %v1110_v36 = vsel %vm788_vm0, %v1845_v22, 0.0  ;;  %1222 = vperm.xlu1 %1796, %v1843_v18   ;;  %v813_v40 = vmax.f32 %v811_v27, %v812_v29  ;;  %v883_v50 = vmax.f32 %v881_v28, %v882_v43  ;;  %v955_v33 = vsub.f32 %v2266_v16, %v896_v25  ;;  %v711_v19 = vpop.xlane.xlu1 %710  ;;  %v81_v18 = vld [vmem:[%s2694_s2 + $0x40] sm:$0xff]  ;;  %v82_v27 = vld [vmem:[%s2694_s2 + $0x48] sm:$0xff] }
 0x1b3   :  { %v1111_v44 = vsel %vm788_vm0, %v1847_v35, 0.0  ;;  %v1011_v45 = vmul.f32 1.442695, %v956_v24  ;;  %1302 = vperm.xlu0 %1797, %v1847_v35   ;;  %v836_v60 = vmax.f32 %v834_v51, %v835_v17  ;;  %v2355_v15 = vadd.f32 %v745_v62, %v99_v10 }
 0x1b4   :  { %v2329_v47 = vadd.f32 %v1111_v44, %v1110_v36  ;;  %v814_v52 = vrot.slane %v813_v40, 1  ;;  %v884_v59 = vrot.slane %v883_v50, 2  ;;  %v1009_v8 = vmul.f32 1.442695, %v955_v33 }
 0x1b5   :  { %v1849_v46 = vpop.eup %1848  ;;  %1858 = vpow2.f32 %v1011_v45  ;;  %v837_v9 = vrot.slane %v836_v60, 4  ;;  %v2359_v54 = vadd.f32 %v747_v6, %v100_v12  ;;  %v906_v0 = vsel %vm788_vm0, %v2355_v15, -inf  ;;  %v741_v25 = vpop.xlane.xlu0 %740 }
 0x1b6   :  { %v1851_v1 = vpop.eup %1850  ;;  %v1101_v53 = vsel %vm788_vm0, %v1849_v46, 0.0  ;;  %1297 = vperm.xlu1 %1796, %v1845_v22   ;;  %v815_v58 = vmax.f32 %v813_v40, %v814_v52  ;;  %v885_v5 = vmax.f32 %v883_v50, %v884_v59  ;;  %1860 = vpow2.f32 %v979_v26  ;;  %v743_v29 = vpop.xlane.xlu1 %742  ;;  %v97_v40 = vld [vmem:[%s2694_s2 + $0xc0] sm:$0xff] }
 0x1b7   :  { %v1853_v55 = vpop.eup %1852  ;;  %v1102_v56 = vsel %vm788_vm0, %v1851_v1, 0.0  ;;  %1862 = vpow2.f32 %v1009_v8  ;;  %v838_v3 = vmax.f32 %v836_v60, %v837_v9  ;;  %v907_v34 = vsel %vm788_vm0, %v2359_v54, -inf  ;;  %v88_v9 = vld [vmem:[%s2694_s2 + $0x78] sm:$0xff] }
 0x1b8   :  { %v1855_v63 = vpop.eup %1854  ;;  %v2338_v2 = vadd.f32 %v1102_v56, %v1101_v53  ;;  %v1029_v4 = vsel %vm788_vm0, %v1853_v55, 0.0  ;;  %1207 = vperm.xlu0 %1797, %v1853_v55   ;;  %v937_v42 = vsub.f32 %v2279_v38, %v815_v58  ;;  %v886_v48 = vrot.slane %v885_v5, 1 }
 0x1b9   :  { %v1030_v37 = vsel %vm788_vm0, %v1855_v63, 0.0  ;;  %v938_v49 = vsub.f32 %v2291_v57, %v815_v58  ;;  %v839_v23 = vrot.slane %v838_v3, 2  ;;  %v2376_v24 = vadd.f32 %v709_v11, %v81_v18  ;;  %v721_v17 = vpop.xlane.xlu0 %720  ;;  %v98_v58 = vld [vmem:[%s2694_s2 + $0xc8] sm:$0xff] }
 0x1ba   :  { %v2342_v16 = vadd.f32 %v1030_v37, %v1029_v4  ;;  %1212 = vperm.xlu1 %1796, %v1855_v63   ;;  %v887_v7 = vmax.f32 %v885_v5, %v886_v48  ;;  %v973_v38 = vmul.f32 1.442695, %v937_v42  ;;  %v2381_v43 = vadd.f32 %v711_v19, %v82_v27  ;;  %v723_v33 = vpop.xlane.xlu1 %722 }
 0x1bb   :  { %v2352_v13 = vpop.eup %1856  ;;  %v975_v57 = vmul.f32 1.442695, %v938_v49  ;;  %v840_v22 = vmax.f32 %v838_v3, %v839_v23  ;;  %v825_v41 = vsel %vm788_vm0, %v2376_v24, -inf  ;;  %v2393_v26 = vadd.f32 %v741_v25, %v97_v40  ;;  %v85_v25 = vld [vmem:[%s2694_s2 + $0x60] sm:$0xff] }
 0x1bc   :  { %1292 = vperm.xlu0 %1797, %v1851_v1   ;;  %v954_v14 = vsub.f32 %v2304_v39, %v887_v7  ;;  %1864 = vpow2.f32 %v973_v38  ;;  %v953_v39 = vsub.f32 %v2295_v61, %v887_v7  ;;  %v908_v61 = vmax.f32 %v906_v0, %v907_v34 }
 0x1bd   :  { %v841_v36 = vrot.slane %v840_v22, 1  ;;  %v826_v51 = vsel %vm788_vm0, %v2381_v43, -inf  ;;  %v2408_v5 = vadd.f32 %v743_v29, %v98_v58  ;;  %v717_v6 = vpop.xlane.xlu0 %716  ;;  %v101_v58 = vld [vmem:[%s2694_s2 + $0xe0] sm:$0xff] }
 0x1be   :  { %1287 = vperm.xlu1 %1796, %v1849_v46   ;;  %v1007_v21 = vmul.f32 1.442695, %v954_v14  ;;  %v1005_v35 = vmul.f32 1.442695, %v953_v39  ;;  %v909_v45 = vrot.slane %v908_v61, 4  ;;  %v827_v52 = vmax.f32 %v825_v41, %v826_v51  ;;  %v755_v11 = vpop.xlane.xlu1 %754 }
 0x1bf   :  { %v2357_v20 = vpop.eup %1858  ;;  %v842_v50 = vmax.f32 %v840_v22, %v841_v36  ;;  %v898_v10 = vsel %vm788_vm0, %v2408_v5, -inf  ;;  %v2421_v14 = vadd.f32 %v723_v33, %v88_v9  ;;  %v1041_v39 = vrot.slane %v2319_v30, 4 }
 0x1c0   :  { %1322 = vperm.xlu0 %1797, %v2357_v20   ;;  %1866 = vpow2.f32 %v1007_v21  ;;  %v2372_v28 = vpop.eup %1860  ;;  %v910_v46 = vmax.f32 %v908_v61, %v909_v45  ;;  %v828_v56 = vrot.slane %v827_v52, 4  ;;  %v104_v61 = vld [vmem:[%s2694_s2 + $0xf8] sm:$0xff]  ;;  %v2441_v45 = vadd.f32 %v717_v6, %v85_v25 }
 0x1c1   :  { %1868 = vpow2.f32 %v975_v57  ;;  %v2383_v44 = vpop.eup %1862  ;;  %v943_v1 = vsub.f32 %v2321_v31, %v842_v50  ;;  %v944_v53 = vsub.f32 %v2323_v32, %v842_v50  ;;  %v87_v31 = vld [vmem:[%s2694_s2 + $0x70] sm:$0xff]  ;;  %v897_v32 = vsel %vm788_vm0, %v2393_v26, -inf  ;;  %v749_v27 = vpop.xlane.xlu0 %748 }
 0x1c2   :  { %1237 = vperm.xlu1 %1796, %v2352_v13   ;;  %1870 = vpow2.f32 %v1005_v35  ;;  %v911_v55 = vrot.slane %v910_v46, 2  ;;  %v829_v37 = vmax.f32 %v827_v52, %v828_v56  ;;  %v2418_v7 = vadd.f32 %v721_v17, %v87_v31  ;;  %v719_v35 = vpop.xlane.xlu1 %718  ;;  %v102_v31 = vld [vmem:[%s2694_s2 + $0xe8] sm:$0xff] }
 0x1c3   :  { %v985_v60 = vmul.f32 1.442695, %v943_v1  ;;  %v987_v62 = vmul.f32 1.442695, %v944_v53  ;;  %v899_v38 = vmax.f32 %v897_v32, %v898_v10  ;;  %v853_v0 = vsel %vm788_vm0, %v2421_v14, -inf }
 0x1c4   :  { %v912_v4 = vmax.f32 %v910_v46, %v911_v55  ;;  %v830_v48 = vrot.slane %v829_v37, 2  ;;  %v852_v57 = vsel %vm788_vm0, %v2418_v7, -inf  ;;  %v1042_v50 = vadd.f32 %v1041_v39, %v2319_v30  ;;  %v86_v46 = vld [vmem:[%s2694_s2 + $0x68] sm:$0xff]  ;;  %v103_v30 = vld [vmem:[%s2694_s2 + $0xf0] sm:$0xff] }
 0x1c5   :  { %1872 = vpow2.f32 %v985_v60  ;;  %v900_v23 = vrot.slane %v899_v38, 4  ;;  %v854_v29 = vmax.f32 %v852_v57, %v853_v0  ;;  %v2449_v1 = vadd.f32 %v755_v11, %v104_v61  ;;  %v753_v55 = vpop.xlane.xlu0 %752 }
 0x1c6   :  { %1242 = vperm.xlu1 %1796, %v2372_v28   ;;  %v2398_v59 = vpop.eup %1864  ;;  %v913_v42 = vrot.slane %v912_v4, 1  ;;  %1874 = vpow2.f32 %v987_v62  ;;  %v831_v12 = vmax.f32 %v829_v37, %v830_v48  ;;  %v843_v56 = vsel %vm788_vm0, %v2441_v45, -inf  ;;  %v751_v32 = vpop.xlane.xlu1 %750 }
 0x1c7   :  { %v901_v34 = vmax.f32 %v899_v38, %v900_v23  ;;  %v855_v17 = vrot.slane %v854_v29, 4  ;;  %v2462_v60 = vadd.f32 %v719_v35, %v86_v46  ;;  %v1043_v62 = vrot.slane %v1042_v50, 2 }
 0x1c8   :  { %v914_v49 = vmax.f32 %v912_v4, %v913_v42  ;;  %v832_v21 = vrot.slane %v831_v12, 1  ;;  %v1113_v6 = vrot.slane %v2329_v47, 4  ;;  %v925_v42 = vsel %vm788_vm0, %v2449_v1, -inf }
 0x1c9   :  { %v902_v51 = vrot.slane %v901_v34, 2  ;;  %v856_v33 = vmax.f32 %v854_v29, %v855_v17  ;;  %v844_v48 = vsel %vm788_vm0, %v2462_v60, -inf  ;;  %v2473_v9 = vadd.f32 %v753_v55, %v103_v30 }
 0x1ca   :  { %1317 = vperm.xlu1 %1796, %v2383_v44   ;;  %v2400_v63 = vpop.eup %1866  ;;  %v959_v3 = vsub.f32 %v2355_v15, %v914_v49  ;;  %v960_v19 = vsub.f32 %v2359_v54, %v914_v49  ;;  %v833_v54 = vmax.f32 %v831_v12, %v832_v21  ;;  %v2475_v49 = vadd.f32 %v749_v27, %v101_v58 }
 0x1cb   :  { %1312 = vperm.xlu0 %1797, %v2400_v63   ;;  %v2411_v8 = vpop.eup %1868  ;;  %v903_v53 = vmax.f32 %v901_v34, %v902_v51  ;;  %v857_v37 = vrot.slane %v856_v33, 2  ;;  %v845_v12 = vmax.f32 %v843_v56, %v844_v48  ;;  %v924_v38 = vsel %vm788_vm0, %v2473_v9, -inf }
 0x1cc   :  { %v2427_v18 = vpop.eup %1870  ;;  %v1017_v15 = vmul.f32 1.442695, %v959_v3  ;;  %v1019_v22 = vmul.f32 1.442695, %v960_v19  ;;  %v941_v36 = vsub.f32 %v2376_v24, %v833_v54  ;;  %v942_v41 = vsub.f32 %v2381_v43, %v833_v54 }
 0x1cd   :  { %v904_v4 = vrot.slane %v903_v53, 1  ;;  %v858_v11 = vmax.f32 %v856_v33, %v857_v37  ;;  %v2479_v3 = vadd.f32 %v751_v32, %v102_v31  ;;  %v2485_v23 = vadd.f32 %v1043_v62, %v1042_v50 }
 0x1ce   :  { %1227 = vperm.xlu1 %1796, %v2398_v59   ;;  %1876 = vpow2.f32 %v1017_v15  ;;  %v981_v52 = vmul.f32 1.442695, %v941_v36  ;;  %v983_v43 = vmul.f32 1.442695, %v942_v41  ;;  %v1114_v0 = vadd.f32 %v1113_v6, %v2329_v47 }
 0x1cf   :  { %v2443_v40 = vpop.eup %1872  ;;  %1878 = vpow2.f32 %v1019_v22  ;;  %v905_v10 = vmax.f32 %v903_v53, %v904_v4  ;;  %v859_v57 = vrot.slane %v858_v11, 1  ;;  %v846_v25 = vrot.slane %v845_v12, 4 }
 0x1d0   :  { %v2452_v24 = vpop.eup %1874  ;;  %1880 = vpow2.f32 %v981_v52  ;;  %v926_v27 = vmax.f32 %v924_v38, %v925_v42  ;;  %v915_v54 = vsel %vm788_vm0, %v2475_v49, -inf  ;;  %v916_v34 = vsel %vm788_vm0, %v2479_v3, -inf }
 0x1d1   :  { %1262 = vperm.xlu0 %1797, %v2452_v24   ;;  %1882 = vpow2.f32 %v983_v43  ;;  %v957_v19 = vsub.f32 %v2393_v26, %v905_v10  ;;  %v958_v21 = vsub.f32 %v2408_v5, %v905_v10  ;;  %v1104_v5 = vrot.slane %v2338_v2, 4 }
 0x1d2   :  { %1232 = vperm.xlu1 %1796, %v2411_v8   ;;  %v860_v29 = vmax.f32 %v858_v11, %v859_v57  ;;  %v847_v61 = vmax.f32 %v845_v12, %v846_v25  ;;  %v927_v35 = vrot.slane %v926_v27, 4  ;;  %v1032_v47 = vrot.slane %v2342_v16, 4 }
 0x1d3   :  { %v1013_v15 = vmul.f32 1.442695, %v957_v19  ;;  %v1015_v22 = vmul.f32 1.442695, %v958_v21  ;;  %v1056_v36 = vsel %vm788_vm0, %v2352_v13, 0.0  ;;  %v1057_v41 = vsel %vm788_vm0, %v2372_v28, 0.0 }
 0x1d4   :  { %v947_v51 = vsub.f32 %v2418_v7, %v860_v29  ;;  %v948_v17 = vsub.f32 %v2421_v14, %v860_v29  ;;  %v917_v46 = vmax.f32 %v915_v54, %v916_v34  ;;  %v848_v43 = vrot.slane %v847_v61, 2 }
 0x1d5   :  { %1884 = vpow2.f32 %v1013_v15  ;;  %v928_v53 = vmax.f32 %v926_v27, %v927_v35  ;;  %v1105_v13 = vadd.f32 %v1104_v5, %v2338_v2  ;;  %v1058_v28 = vadd.f32 %v1057_v41, %v1056_v36 }
 0x1d6   :  { %1307 = vperm.xlu1 %1796, %v2427_v18   ;;  %1886 = vpow2.f32 %v1015_v22  ;;  %v993_v33 = vmul.f32 1.442695, %v947_v51  ;;  %v995_v30 = vmul.f32 1.442695, %v948_v17  ;;  %v1045_v55 = vrot.slane %v2485_v23, 1 }
 0x1d7   :  { %v849_v56 = vmax.f32 %v847_v61, %v848_v43  ;;  %v929_v58 = vrot.slane %v928_v53, 2  ;;  %v1115_v7 = vrot.slane %v1114_v0, 2  ;;  %v1033_v14 = vadd.f32 %v1032_v47, %v2342_v16 }
 0x1d8   :  { %v2483_v39 = vpop.eup %1876  ;;  %1888 = vpow2.f32 %v993_v33  ;;  %v918_v62 = vrot.slane %v917_v46, 4  ;;  %v1128_v4 = vsel %vm788_vm0, %v2383_v44, 0.0  ;;  %v1129_v2 = vsel %vm788_vm0, %v2357_v20, 0.0 }
 0x1d9   :  { %v2493_v26 = vpop.eup %1878  ;;  %v850_v37 = vrot.slane %v849_v56, 1  ;;  %v930_v31 = vmax.f32 %v928_v53, %v929_v58  ;;  %v1106_v32 = vrot.slane %v1105_v13, 2  ;;  %v1059_v6 = vrot.slane %v1058_v28, 4 }
 0x1da   :  { %1257 = vperm.xlu1 %1796, %v2443_v40   ;;  %1342 = vperm.xlu0 %1797, %v2493_v26   ;;  %v2502_v50 = vpop.eup %1880  ;;  %1890 = vpow2.f32 %v995_v30  ;;  %v919_v42 = vmax.f32 %v917_v46, %v918_v62  ;;  %v1047_v48 = vsel %vm788_vm0, %v2398_v59, 0.0  ;;  %v1048_v16 = vsel %vm788_vm0, %v2411_v8, 0.0 }
 0x1db   :  { %v2506_v52 = vpop.eup %1882  ;;  %v851_v10 = vmax.f32 %v849_v56, %v850_v37  ;;  %v931_v11 = vrot.slane %v930_v31, 1  ;;  %v1034_v12 = vrot.slane %v1033_v14, 2  ;;  %v1130_v38 = vadd.f32 %v1129_v2, %v1128_v4 }
 0x1dc   :  { %v1119_v44 = vsel %vm788_vm0, %v2427_v18, 0.0  ;;  %v920_v20 = vrot.slane %v919_v42, 2  ;;  %v1120_v21 = vsel %vm788_vm0, %v2400_v63, 0.0  ;;  %v2527_v15 = vadd.f32 %v1115_v7, %v1114_v0 }
 0x1dd   :  { %v945_v57 = vsub.f32 %v2441_v45, %v851_v10  ;;  %v946_v25 = vsub.f32 %v2462_v60, %v851_v10  ;;  %v932_v59 = vmax.f32 %v930_v31, %v931_v11  ;;  %v1060_v8 = vadd.f32 %v1059_v6, %v1058_v28 }
 0x1de   :  { %1337 = vperm.xlu1 %1796, %v2483_v39   ;;  %1252 = vperm.xlu0 %1797, %v2506_v52   ;;  %v1049_v22 = vadd.f32 %v1048_v16, %v1047_v48  ;;  %v921_v54 = vmax.f32 %v919_v42, %v920_v20  ;;  %v1074_v18 = vsel %vm788_vm0, %v2443_v40, 0.0  ;;  %v1075_v34 = vsel %vm788_vm0, %v2452_v24, 0.0 }
 0x1df   :  { %v1885_v19 = vpop.eup %1884  ;;  %v989_v5 = vmul.f32 1.442695, %v945_v57  ;;  %v991_v63 = vmul.f32 1.442695, %v946_v25  ;;  %v1131_v45 = vrot.slane %v1130_v38, 4  ;;  %v1121_v29 = vadd.f32 %v1120_v21, %v1119_v44 }
 0x1e0   :  { %v1887_v27 = vpop.eup %1886  ;;  %v963_v60 = vsub.f32 %v2473_v9, %v932_v59  ;;  %v964_v0 = vsub.f32 %v2449_v1, %v932_v59  ;;  %v1107_v61 = vadd.f32 %v1106_v32, %v1105_v13  ;;  %v1035_v35 = vadd.f32 %v1034_v12, %v1033_v14 }
 0x1e1   :  { %1892 = vpow2.f32 %v989_v5  ;;  %v922_v47 = vrot.slane %v921_v54, 1  ;;  %v1050_v41 = vrot.slane %v1049_v22, 4  ;;  %v1076_v51 = vadd.f32 %v1075_v34, %v1074_v18 }
 0x1e2   :  { %1247 = vperm.xlu1 %1796, %v2502_v50   ;;  %1332 = vperm.xlu0 %1797, %v1887_v27   ;;  %v1889_v36 = vpop.eup %1888  ;;  %v1025_v40 = vmul.f32 1.442695, %v963_v60  ;;  %v1027_v17 = vmul.f32 1.442695, %v964_v0  ;;  %v1146_v24 = vsel %vm788_vm0, %v2483_v39, 0.0  ;;  %v1147_v46 = vsel %vm788_vm0, %v2493_v26, 0.0 }
 0x1e3   :  { %1894 = vpow2.f32 %v991_v63  ;;  %v923_v43 = vmax.f32 %v921_v54, %v922_v47  ;;  %v1061_v1 = vrot.slane %v1060_v8, 2  ;;  %v1132_v53 = vadd.f32 %v1131_v45, %v1130_v38 }
 0x1e4   :  { %v1891_v9 = vpop.eup %1890  ;;  %v1122_v13 = vrot.slane %v1121_v29, 4  ;;  %1896 = vpow2.f32 %v1025_v40  ;;  %v1065_v28 = vsel %vm788_vm0, %v2502_v50, 0.0  ;;  %v1066_v33 = vsel %vm788_vm0, %v2506_v52, 0.0 }
 0x1e5   :  { %v961_v30 = vsub.f32 %v2475_v49, %v923_v43  ;;  %v962_v39 = vsub.f32 %v2479_v3, %v923_v43  ;;  %v1051_v26 = vadd.f32 %v1050_v41, %v1049_v22  ;;  %v1077_v56 = vrot.slane %v1076_v51, 4 }
 0x1e6   :  { %1327 = vperm.xlu1 %1796, %v1885_v19   ;;  %1282 = vperm.xlu0 %1797, %v1891_v9   ;;  %v1148_v58 = vadd.f32 %v1147_v46, %v1146_v24  ;;  %1898 = vpow2.f32 %v1027_v17  ;;  %v1137_v7 = vsel %vm788_vm0, %v1885_v19, 0.0  ;;  %v1138_v14 = vsel %vm788_vm0, %v1887_v27, 0.0 }
 0x1e7   :  { %v1021_v62 = vmul.f32 1.442695, %v961_v30  ;;  %v1023_v4 = vmul.f32 1.442695, %v962_v39  ;;  %v1108_v2 = vrot.slane %v1107_v61, 1  ;;  %v1036_v50 = vrot.slane %v1035_v35, 1 }
 0x1e8   :  { %v1067_v37 = vadd.f32 %v1066_v33, %v1065_v28  ;;  %v1133_v31 = vrot.slane %v1132_v53, 2  ;;  %v1123_v52 = vadd.f32 %v1122_v13, %v1121_v29  ;;  %v1062_v49 = vadd.f32 %v1061_v1, %v1060_v8 }
 0x1e9   :  { %1900 = vpow2.f32 %v1021_v62  ;;  %v1149_v32 = vrot.slane %v1148_v58, 4  ;;  %v1139_v3 = vadd.f32 %v1138_v14, %v1137_v7  ;;  %v1046_v42 = vadd.f32 %v1045_v55, %v2485_v23 }
 0x1ea   :  { %1277 = vperm.xlu1 %1796, %v1889_v36   ;;  %1902 = vpow2.f32 %v1023_v4  ;;  %v1117_v48 = vrot.slane %v2527_v15, 1  ;;  %v1052_v16 = vrot.slane %v1051_v26, 2  ;;  %v1078_v10 = vadd.f32 %v1077_v56, %v1076_v51 }
 0x1eb   :  { %v1893_v6 = vpop.eup %1892  ;;  %v1109_v11 = vadd.f32 %v1108_v2, %v1107_v61  ;;  %v1037_v12 = vadd.f32 %v1036_v50, %v1035_v35  ;;  %v1068_v38 = vrot.slane %v1067_v37, 4  ;;  %v1134_v19 = vadd.f32 %v1133_v31, %v1132_v53 }
 0x1ec   :  { %v1083_v44 = vsel %vm788_vm0, %v1893_v6, 0.0  ;;  %v1124_v21 = vrot.slane %v1123_v52, 2  ;;  %v1092_v57 = vsel %vm788_vm0, %v1889_v36, 0.0  ;;  %v1093_v25 = vsel %vm788_vm0, %v1891_v9, 0.0 }
 0x1ed   :  { %v1895_v20 = vpop.eup %1894  ;;  %v1063_v27 = vrot.slane %v1062_v49, 1  ;;  %v1150_v8 = vadd.f32 %v1149_v32, %v1148_v58  ;;  %v1140_v23 = vrot.slane %v1139_v3, 4  ;;  %v1053_v22 = vadd.f32 %v1052_v16, %v1051_v26 }
 0x1ee   :  { %v1897_v59 = vpop.eup %1896  ;;  %v1084_v55 = vsel %vm788_vm0, %v1895_v20, 0.0  ;;  %v1079_v54 = vrot.slane %v1078_v10, 2  ;;  %v1118_v63 = vadd.f32 %v1117_v48, %v2527_v15  ;;  %1904 = vrcp.f32 %v1037_v12 }
 0x1ef   :  { %v1085_v18 = vadd.f32 %v1084_v55, %v1083_v44  ;;  %v1164_v34 = vsel %vm788_vm0, %v1897_v59, 0.0  ;;  %1357 = vperm.xlu1 %1796, %v1897_v59   ;;  %v1069_v45 = vadd.f32 %v1068_v38, %v1067_v37  ;;  %v1094_v29 = vadd.f32 %v1093_v25, %v1092_v57 }
 0x1f0   :  { %v1899_v5 = vpop.eup %1898  ;;  %v1135_v60 = vrot.slane %v1134_v19, 1  ;;  %v1125_v0 = vadd.f32 %v1124_v21, %v1123_v52  ;;  %1906 = vrcp.f32 %v1046_v42  ;;  %v1151_v47 = vrot.slane %v1150_v8, 2 }
 0x1f1   :  { %v1086_v61 = vrot.slane %v1085_v18, 4  ;;  %v1165_v35 = vsel %vm788_vm0, %v1899_v5, 0.0  ;;  %1362 = vperm.xlu0 %1797, %v1899_v5   ;;  %v1141_v36 = vadd.f32 %v1140_v23, %v1139_v3  ;;  %1908 = vrcp.f32 %v1109_v11 }
 0x1f2   :  { %v1166_v41 = vadd.f32 %v1165_v35, %v1164_v34  ;;  %v1064_v40 = vadd.f32 %v1063_v27, %v1062_v49  ;;  %v1054_v17 = vrot.slane %v1053_v22, 1  ;;  %v1080_v24 = vadd.f32 %v1079_v54, %v1078_v10 }
 0x1f3   :  { %v1901_v51 = vpop.eup %1900  ;;  %1267 = vperm.xlu1 %1796, %v1893_v6   ;;  %v1070_v46 = vrot.slane %v1069_v45, 2  ;;  %v1095_v43 = vrot.slane %v1094_v29, 4  ;;  %v1087_v9 = vadd.f32 %v1086_v61, %v1085_v18  ;;  %1910 = vrcp.f32 %v1118_v63 }
 0x1f4   :  { %v1903_v15 = vpop.eup %1902  ;;  %v1155_v1 = vsel %vm788_vm0, %v1901_v51, 0.0  ;;  %v1136_v53 = vadd.f32 %v1135_v60, %v1134_v19  ;;  %v1126_v13 = vrot.slane %v1125_v0, 1  ;;  %v1152_v33 = vadd.f32 %v1151_v47, %v1150_v8 }
 0x1f5   :  { %v1156_v28 = vsel %vm788_vm0, %v1903_v15, 0.0  ;;  %1272 = vperm.xlu0 %1797, %v1895_v20   ;;  %v1142_v30 = vrot.slane %v1141_v36, 2  ;;  %v1167_v39 = vrot.slane %v1166_v41, 4  ;;  %1912 = vrcp.f32 %v1064_v40  ;;  %v1936_v40 = vld [vmem:[%s2692_s0 + $0x8] sm:$0xff]  }
 0x1f6   :  { %v1157_v26 = vadd.f32 %v1156_v28, %v1155_v1  ;;  %v1055_v56 = vadd.f32 %v1054_v17, %v1053_v22  ;;  %v1081_v58 = vrot.slane %v1080_v24, 1  ;;  %v1071_v7 = vadd.f32 %v1070_v46, %v1069_v45 }
 0x1f7   :  { %1347 = vperm.xlu1 %1796, %v1901_v51   ;;  %v1096_v14 = vadd.f32 %v1095_v43, %v1094_v29  ;;  %v1088_v62 = vrot.slane %v1087_v9, 2  ;;  %1914 = vrcp.f32 %v1136_v53  ;;  %v1127_v2 = vadd.f32 %v1126_v13, %v1125_v0  ;;  %v1937_v13 = vld [vmem:[%s2692_s0] sm:$0xff]  }
 0x1f8   :  { %v1158_v4 = vrot.slane %v1157_v26, 4  ;;  %v1905_v50 = vpop.eup %1904  ;;  %v1153_v37 = vrot.slane %v1152_v33, 1  ;;  %v1143_v31 = vadd.f32 %v1142_v30, %v1141_v36  ;;  %v1168_v52 = vadd.f32 %v1167_v39, %v1166_v41 }
 0x1f9   :  { %1352 = vperm.xlu0 %1797, %v1903_v15   ;;  %1916 = vrcp.f32 %v1055_v56  ;;  %v1082_v32 = vadd.f32 %v1081_v58, %v1080_v24  ;;  %v1072_v6 = vrot.slane %v1071_v7, 1  ;;  %v1097_v42 = vrot.slane %v1096_v14, 2 }
 0x1fa   :  { %v1159_v49 = vadd.f32 %v1158_v4, %v1157_v26  ;;  %v1907_v3 = vpop.eup %1906  ;;  %v1089_v48 = vadd.f32 %v1088_v62, %v1087_v9  ;;  %1918 = vrcp.f32 %v1127_v2  ;;  %v1154_v11 = vadd.f32 %v1153_v37, %v1152_v33  ;;  %v1938_v26 = vld [vmem:[%s2692_s0 + $0x40] sm:$0xff]  }
 0x1fb   :  { %1527 = vperm.xlu1 %1796, %v1905_v50   ;;  %v1909_v10 = vpop.eup %1908  ;;  %v1144_v12 = vrot.slane %v1143_v31, 1  ;;  %v1169_v38 = vrot.slane %v1168_v52, 2  ;;  %1920 = vrcp.f32 %v1082_v32  ;;  %v1073_v19 = vadd.f32 %v1072_v6, %v1071_v7 }
 0x1fc   :  { %v1160_v16 = vrot.slane %v1159_v49, 2  ;;  %v1098_v21 = vadd.f32 %v1097_v42, %v1096_v14  ;;  %v1090_v57 = vrot.slane %v1089_v48, 1  ;;  %1922 = vrcp.f32 %v1154_v11 }
 0x1fd   :  { %1532 = vperm.xlu0 %1797, %v1907_v3   ;;  %v1911_v20 = vpop.eup %1910  ;;  %v1145_v59 = vadd.f32 %v1144_v12, %v1143_v31  ;;  %v1170_v27 = vadd.f32 %v1169_v38, %v1168_v52  ;;  %1924 = vrcp.f32 %v1073_v19  ;;  %v1175_v17 = vunpack.c.l.bf16 %v1936_v40  ;;  %v1939_v38 = vld [vmem:[%s2692_s0 + $0x48] sm:$0xff]  }
 0x1fe   :  { %v1161_v44 = vadd.f32 %v1160_v16, %v1159_v49  ;;  %v1099_v55 = vrot.slane %v1098_v21, 1  ;;  %v1091_v22 = vadd.f32 %v1090_v57, %v1089_v48  ;;  %v1176_v24 = vunpack.c.h.bf16 %v1936_v40  ;;  %v1942_v40 = vld [vmem:[%s2692_s0 + $0x58] sm:$0xff]  }
 0x1ff   :  { %1567 = vperm.xlu1 %1796, %v1909_v10   ;;  %v1913_v25 = vpop.eup %1912  ;;  %1926 = vrcp.f32 %v1145_v59  ;;  %v1171_v18 = vrot.slane %v1170_v27, 1  ;;  %v1173_v28 = vunpack.c.l.bf16 %v1937_v13  ;;  %v1174_v33 = vunpack.c.h.bf16 %v1937_v13 }
 0x200   :  { %v1162_v8 = vrot.slane %v1161_v44, 1  ;;  %v1100_v63 = vadd.f32 %v1099_v55, %v1098_v21  ;;  %1928 = vrcp.f32 %v1091_v22  ;;  %v1189_v56 = vunpack.c.l.bf16 %v1938_v26 }
 0x201   :  { %1572 = vperm.xlu0 %1797, %v1911_v20   ;;  %v1915_v23 = vpop.eup %1914  ;;  %v1172_v29 = vadd.f32 %v1171_v18, %v1170_v27  ;;  %v1190_v58 = vunpack.c.h.bf16 %v1938_v26  ;;  %v1192_v19 = vunpack.c.h.bf16 %v1939_v38  ;;  %v2619_v26 = vld [vmem:[%s2692_s0 + $0x68] sm:$0xff]  }
 0x202   :  { %v1163_v34 = vadd.f32 %v1162_v8, %v1161_v44  ;;  %v1191_v44 = vunpack.c.l.bf16 %v1939_v38  ;;  %v2641_v38 = vld [vmem:[%s2692_s0 + $0x78] sm:$0xff]  }
 0x203   :  { %1542 = vperm.xlu1 %1796, %v1913_v25   ;;  %v1917_v54 = vpop.eup %1916 }
 0x204   :  { %v1919_v5 = vpop.eup %1918  ;;  %1930 = vrcp.f32 %v1163_v34 }
 0x205   :  { %1582 = vperm.xlu0 %1797, %v1915_v23   ;;  %v1921_v45 = vpop.eup %1920  ;;  %1932 = vrcp.f32 %v1100_v63  ;;  %v1941_v63 = vld [vmem:[%s2692_s0 + $0x18] sm:$0xff]  }
 0x206   :  { %v1923_v60 = vpop.eup %1922  ;;  %1934 = vrcp.f32 %v1172_v29 }
 0x207   :  { %1537 = vperm.xlu1 %1796, %v1917_v54   ;;  %v1925_v0 = vpop.eup %1924  ;;  %v1940_v54 = vld [vmem:[%s2692_s0 + $0x10] sm:$0xff]  }
 0x208   :  { %v1178_v18 = vunpack.c.h.bf16 %v1940_v54  ;;  %v1177_v29 = vunpack.c.l.bf16 %v1940_v54  ;;  %v1950_v54 = vld [vmem:[%s2692_s0 + $0x30] sm:$0xff]  }
 0x209   :  { %1577 = vperm.xlu0 %1797, %v1919_v5   ;;  %v1927_v61 = vpop.eup %1926 }
 0x20a   :  { %v1929_v35 = vpop.eup %1928 }
 0x20b   :  { %1552 = vperm.xlu1 %1796, %v1921_v45   ;;  %v1180_v45 = vunpack.c.h.bf16 %v1941_v63 }
 0x20d   :  { %1592 = vperm.xlu0 %1797, %v1923_v60  }
 0x20e   :  { %v1931_v47 = vpop.eup %1930 }
 0x20f   :  { %1547 = vperm.xlu1 %1796, %v1925_v0   ;;  %v1933_v36 = vpop.eup %1932 }
 0x210   :  { %v1935_v41 = vpop.eup %1934 }
 0x211   :  { %1587 = vperm.xlu0 %1797, %v1927_v61  }
 0x213   :  { %1557 = vperm.xlu1 %1796, %v1929_v35   ;;  %v1179_v35 = vunpack.c.l.bf16 %v1941_v63 }
 0x215   :  { %1597 = vperm.xlu0 %1797, %v1931_v47  }
 0x217   :  { %1562 = vperm.xlu1 %1796, %v1933_v36  }
 0x219   :  { %1602 = vperm.xlu0 %1797, %v1935_v41  }
 0x22d   :  { %v1218_v51 = vpop.permute.xlu1 %1217 }
 0x22e   :  { %v1367_v46 = vmul.f32 %v1218_v51, %v1175_v17  ;;  %v1196_v17 = vunpack.c.h.bf16 %v1942_v40 }
 0x231   :  { %v1223_v15 = vpop.permute.xlu1 %1222 }
 0x232   :  { %v1303_v43 = vpop.permute.xlu0 %1302  ;;  %v1368_v9 = vmul.f32 %v1223_v15, %v1176_v24 }
 0x233   :  { %v1384_v25 = vmul.f32 %v1303_v43, %v1192_v19 }
 0x234   :  { %v1404_v1 = vadd.f32 %v1368_v9, %v1367_v46  ;;  %v1943_v46 = vld [vmem:[%s2692_s0 + $0x50] sm:$0xff]   ;;  %v2613_v9 = vld [vmem:[%s2692_s0 + $0x28] sm:$0xff]  }
 0x235   :  { %v1298_v53 = vpop.permute.xlu1 %1297  ;;  %v1194_v43 = vunpack.c.h.bf16 %v1943_v46  ;;  %v1193_v13 = vunpack.c.l.bf16 %v1943_v46 }
 0x236   :  { %v1383_v57 = vmul.f32 %v1298_v53, %v1191_v44  ;;  %v1405_v59 = vrot.slane %v1404_v1, 4  ;;  %v1195_v53 = vunpack.c.l.bf16 %v1942_v40  ;;  %v1204_v44 = vunpack.c.h.bf16 %v2641_v38 }
 0x237   :  { %v1208_v30 = vpop.permute.xlu0 %1207  ;;  %v1185_v40 = vunpack.c.l.bf16 %v1950_v54 }
 0x238   :  { %v1365_v7 = vmul.f32 %v1208_v30, %v1173_v28  ;;  %v1460_v8 = vadd.f32 %v1384_v25, %v1383_v57  ;;  %v1406_v34 = vadd.f32 %v1405_v59, %v1404_v1  ;;  %v1184_v1 = vunpack.c.h.bf16 %v2613_v9 }
 0x239   :  { %v1213_v39 = vpop.permute.xlu1 %1212 }
 0x23a   :  { %v1366_v14 = vmul.f32 %v1213_v39, %v1174_v33  ;;  %v1461_v5 = vrot.slane %v1460_v8, 4  ;;  %v1407_v41 = vrot.slane %v1406_v34, 2 }
 0x23b   :  { %v1293_v62 = vpop.permute.xlu0 %1292 }
 0x23c   :  { %v1397_v4 = vadd.f32 %v1366_v14, %v1365_v7  ;;  %v1382_v50 = vmul.f32 %v1293_v62, %v1190_v58  ;;  %v1462_v51 = vadd.f32 %v1461_v5, %v1460_v8  ;;  %v1946_v58 = vld [vmem:[%s2692_s0 + $0x20] sm:$0xff]   ;;  %v1951_v5 = vld [vmem:[%s2692_s0 + $0x70] sm:$0xff]  }
 0x23d   :  { %v1288_v2 = vpop.permute.xlu1 %1287  ;;  %v1182_v7 = vunpack.c.h.bf16 %v1946_v58  ;;  %v1947_v14 = vld [vmem:[%s2692_s0 + $0x60] sm:$0xff]   ;;  %v1202_v63 = vunpack.c.h.bf16 %v1951_v5 }
 0x23e   :  { %v1381_v37 = vmul.f32 %v1288_v2, %v1189_v56  ;;  %v1398_v55 = vrot.slane %v1397_v4, 4  ;;  %v1200_v56 = vunpack.c.h.bf16 %v2619_v26  ;;  %v1198_v62 = vunpack.c.h.bf16 %v1947_v14 }
 0x23f   :  { %v2571_v42 = vpop.permute.xlu0 %1322  ;;  %v1408_v2 = vadd.f32 %v1407_v41, %v1406_v34  ;;  %v1197_v19 = vunpack.c.l.bf16 %v1947_v14  ;;  %v1203_v41 = vunpack.c.l.bf16 %v2641_v38 }
 0x240   :  { %v1453_v31 = vadd.f32 %v1382_v50, %v1381_v37  ;;  %v1399_v0 = vadd.f32 %v1398_v55, %v1397_v4  ;;  %v2633_v37 = vld [vmem:[%s2692_s0 + $0x38] sm:$0xff]   ;;  %s1978_s0 = smov [#allocation2]  }
 0x241   :  { %v1238_v52 = vpop.permute.xlu1 %1237  ;;  %v1187_v34 = vunpack.c.l.bf16 %v2633_v37  ;;  %s1667_s28 = sshll.u32 %s1978_s0, 4  ;;  %s1668_s28 = int_to_ptr.vmem [resolvable:$true] %s1667_s28 }
 0x242   :  { %v1454_v22 = vrot.slane %v1453_v31, 4  ;;  %v1371_v28 = vmul.f32 %v1238_v52, %v1179_v35  ;;  %v1400_v30 = vrot.slane %v1399_v0, 2  ;;  %v1183_v52 = vunpack.c.l.bf16 %v2613_v9  ;;  %s1952_s29 = scalar_lea.vmem %s1668_s28, 256  ;;  %p1957_p1 = scmp.lt.s32.totalorder %s1668_s28, %s1668_s28 }
 0x243   :  { %p1953_p0 = scmp.ne.s32.totalorder %s1668_s28, %s1952_s29  ;;  %p1958_p2 = scmp.lt.s32.totalorder %s1952_s29, %s1952_s29 }
 0x244   :  { %v1455_v61 = vadd.f32 %v1454_v22, %v1453_v31  ;;  %v1188_v31 = vunpack.c.h.bf16 %v2633_v37  ;;  %v1401_v8 = vadd.f32 %v1400_v30, %v1399_v0 }
 0x245   :  { %v1243_v49 = vpop.permute.xlu1 %1242  ;;  %p1959_p3 = por %p1958_p2, %p1957_p1 }
 0x246   :  { %v1372_v24 = vmul.f32 %v1243_v49, %v1180_v45  ;;  %v1456_v39 = vrot.slane %v1455_v61, 2  ;;  %v1463_v49 = vrot.slane %v1462_v51, 2  ;;  %v1409_v45 = vrot.slane %v1408_v2, 1 }
 0x247   :  { %p1960_p4 = pnand %p1959_p3, %p1953_p0 }
 0x248   :  { %v1418_v50 = vadd.f32 %v1372_v24, %v1371_v28  ;;  %v1457_v55 = vadd.f32 %v1456_v39, %v1455_v61  ;;  %v1464_v0 = vadd.f32 %v1463_v49, %v1462_v51  ;;  %v1388_v61 = vmul.f32 %v2571_v42, %v1196_v17 }
 0x249   :  { %v2569_v32 = vpop.permute.xlu1 %1317  ;;  %v1201_v39 = vunpack.c.l.bf16 %v1951_v5  ;;  %v1410_v42 = vadd.f32 %v1409_v45, %v1408_v2 }
 0x24a   :  { %v2575_v16 = vpop.permute.xlu0 %1312  ;;  %v1419_v35 = vrot.slane %v1418_v50, 4  ;;  %v1458_v28 = vrot.slane %v1457_v55, 1  ;;  %v1465_v17 = vrot.slane %v1464_v0, 1 }
 0x24d   :  { %v1228_v3 = vpop.permute.xlu1 %1227 }
 0x24e   :  { %v1369_v15 = vmul.f32 %v1228_v3, %v1177_v29  ;;  %v1199_v3 = vunpack.c.l.bf16 %v2619_v26  ;;  %v1386_v29 = vmul.f32 %v2575_v16, %v1194_v43 }
 0x250   :  { %v2579_v11 = vpop.permute.xlu0 %1262 }
 0x251   :  { %v1233_v6 = vpop.permute.xlu1 %1232 }
 0x252   :  { %v1370_v47 = vmul.f32 %v1233_v6, %v1178_v18  ;;  %v1181_v6 = vunpack.c.l.bf16 %v1946_v58  ;;  %v1186_v18 = vunpack.c.h.bf16 %v1950_v54 }
 0x254   :  { %v1411_v33 = vadd.f32 %v1370_v47, %v1369_v15 }
 0x255   :  { %v2573_v48 = vpop.permute.xlu1 %1307 }
 0x256   :  { %v1412_v25 = vrot.slane %v1411_v33, 4  ;;  %v1385_v59 = vmul.f32 %v2573_v48, %v1193_v13  ;;  %v1387_v48 = vmul.f32 %v2569_v32, %v1195_v53  ;;  %v1402_v13 = vrot.slane %v1401_v8, 1 }
 0x257   :  { %v1420_v32 = vadd.f32 %v1419_v35, %v1418_v50 }
 0x258   :  { %v1413_v15 = vadd.f32 %v1412_v25, %v1411_v33  ;;  %v1467_v46 = vadd.f32 %v1386_v29, %v1385_v59  ;;  %v1474_v51 = vadd.f32 %v1388_v61, %v1387_v48  ;;  %v1459_v25 = vadd.f32 %v1458_v28, %v1457_v55 }
 0x259   :  { %v2577_v10 = vpop.permute.xlu1 %1257  ;;  %v2586_v20 = vpop.permute.xlu0 %1342 }
 0x25a   :  { %v1375_v53 = vmul.f32 %v2577_v10, %v1183_v52  ;;  %v1468_v49 = vrot.slane %v1467_v46, 4  ;;  %v1475_v59 = vrot.slane %v1474_v51, 4  ;;  %v1392_v9 = vmul.f32 %v2586_v20, %v1200_v56 }
 0x25b   :  { %v1466_v20 = vadd.f32 %v1465_v17, %v1464_v0 }
 0x25c   :  { %v1469_v45 = vadd.f32 %v1468_v49, %v1467_v46 }
 0x25d   :  { %v2581_v12 = vpop.permute.xlu1 %1337  ;;  %v2590_v27 = vpop.permute.xlu0 %1252 }
 0x25e   :  { %v1374_v30 = vmul.f32 %v2590_v27, %v1182_v7  ;;  %v1414_v27 = vrot.slane %v1413_v15, 2  ;;  %v1470_v46 = vrot.slane %v1469_v45, 2 }
 0x261   :  { %v2588_v21 = vpop.permute.xlu1 %1247  ;;  %v2600_v60 = vpop.permute.xlu0 %1332 }
 0x262   :  { %v1373_v47 = vmul.f32 %v2588_v21, %v1181_v6  ;;  %v1390_v21 = vmul.f32 %v2600_v60, %v1198_v62  ;;  %v1403_v6 = vadd.f32 %v1402_v13, %v1401_v8  ;;  %v1391_v60 = vmul.f32 %v2581_v12, %v1199_v3 }
 0x263   :  { %v1421_v62 = vrot.slane %v1420_v32, 2 }
 0x264   :  { %v1425_v58 = vadd.f32 %v1374_v30, %v1373_v47  ;;  %v1488_v29 = vadd.f32 %v1392_v9, %v1391_v60 }
 0x265   :  { %v2592_v23 = vpop.permute.xlu1 %1327  ;;  %v2628_v4 = vpop.permute.xlu0 %1282  ;;  %v1422_v37 = vadd.f32 %v1421_v62, %v1420_v32 }
 0x266   :  { %v1389_v16 = vmul.f32 %v2592_v23, %v1197_v19  ;;  %v1376_v23 = vmul.f32 %v2579_v11, %v1184_v1  ;;  %v1426_v54 = vrot.slane %v1425_v58, 4  ;;  %v1380_v11 = vmul.f32 %v2628_v4, %v1188_v31 }
 0x267   :  { %v1489_v13 = vrot.slane %v1488_v29, 4  ;;  %v1423_v30 = vrot.slane %v1422_v37, 1 }
 0x268   :  { %v1481_v7 = vadd.f32 %v1390_v21, %v1389_v16  ;;  %v1432_v52 = vadd.f32 %v1376_v23, %v1375_v53  ;;  %v1427_v26 = vadd.f32 %v1426_v54, %v1425_v58  ;;  %v1471_v21 = vadd.f32 %v1470_v46, %v1469_v45 }
 0x269   :  { %v2602_v36 = vpop.permute.xlu1 %1277  ;;  %v1490_v53 = vadd.f32 %v1489_v13, %v1488_v29  ;;  %v1424_v49 = vadd.f32 %v1423_v30, %v1422_v37 }
 0x26a   :  { %v1379_v10 = vmul.f32 %v2602_v36, %v1187_v34  ;;  %v1482_v12 = vrot.slane %v1481_v7, 4  ;;  %v1415_v34 = vadd.f32 %v1414_v27, %v1413_v15  ;;  %v1433_v47 = vrot.slane %v1432_v52, 4 }
 0x26b   :  { %v1428_v0 = vrot.slane %v1427_v26, 2 }
 0x26c   :  { %v1446_v35 = vadd.f32 %v1380_v11, %v1379_v10 }
 0x26e   :  { %v1358_v57 = vpop.permute.xlu1 %1357  ;;  %v1447_v38 = vrot.slane %v1446_v35, 4 }
 0x26f   :  { %v1395_v1 = vmul.f32 %v1358_v57, %v1203_v41  ;;  %v1476_v41 = vadd.f32 %v1475_v59, %v1474_v51 }
 0x270   :  { %v1363_v22 = vpop.permute.xlu0 %1362  ;;  %v1448_v58 = vadd.f32 %v1447_v38, %v1446_v35 }
 0x272   :  { %v1268_v24 = vpop.permute.xlu1 %1267 }
 0x273   :  { %v1377_v33 = vmul.f32 %v1268_v24, %v1185_v40  ;;  %v1483_v40 = vadd.f32 %v1482_v12, %v1481_v7 }
 0x274   :  { %v1273_v43 = vpop.permute.xlu0 %1272 }
 0x275   :  { %v1378_v50 = vmul.f32 %v1273_v43, %v1186_v18  ;;  %v1434_v43 = vadd.f32 %v1433_v47, %v1432_v52  ;;  %v1484_v51 = vrot.slane %v1483_v40, 2  ;;  %v1491_v52 = vrot.slane %v1490_v53, 2 }
 0x276   :  { %v1348_v14 = vpop.permute.xlu1 %1347 }
 0x277   :  { %v1393_v2 = vmul.f32 %v1348_v14, %v1201_v39  ;;  %v1439_v8 = vadd.f32 %v1378_v50, %v1377_v33  ;;  %v1477_v33 = vrot.slane %v1476_v41, 2  ;;  %v1435_v50 = vrot.slane %v1434_v43, 2 }
 0x278   :  { %v1353_v19 = vpop.permute.xlu0 %1352  ;;  %v1485_v60 = vadd.f32 %v1484_v51, %v1483_v40  ;;  %v1492_v29 = vadd.f32 %v1491_v52, %v1490_v53 }
 0x279   :  { %v1394_v5 = vmul.f32 %v1353_v19, %v1202_v63  ;;  %v1396_v63 = vmul.f32 %v1363_v22, %v1204_v44  ;;  %v1440_v61 = vrot.slane %v1439_v8, 4  ;;  %v1416_v22 = vrot.slane %v1415_v34, 1 }
 0x27a   :  { %v1528_v55 = vpop.permute.xlu1 %1527  ;;  %v1478_v62 = vadd.f32 %v1477_v33, %v1476_v41  ;;  %v1493_v41 = vrot.slane %v1492_v29, 1 }
 0x27b   :  { %v1605_v18 = vmul.f32 %v1528_v55, %v1403_v6  ;;  %v1495_v36 = vadd.f32 %v1394_v5, %v1393_v2  ;;  %v1502_v4 = vadd.f32 %v1396_v63, %v1395_v1  ;;  %v1441_v28 = vadd.f32 %v1440_v61, %v1439_v8 }
 0x27c   :  { %v1533_v3 = vpop.permute.xlu0 %1532  ;;  %v1417_v14 = vadd.f32 %v1416_v22, %v1415_v34  ;;  %v1472_v2 = vrot.slane %v1471_v21, 1  ;;  %v1449_v5 = vrot.slane %v1448_v58, 2  ;;  %v1436_v1 = vadd.f32 %v1435_v50, %v1434_v43 }
 0x27d   :  { %v1606_v48 = vmul.f32 %v1533_v3, %v1410_v42  ;;  %v1496_v15 = vrot.slane %v1495_v36, 4  ;;  %v1503_v39 = vrot.slane %v1502_v4, 4  ;;  %v1442_v27 = vrot.slane %v1441_v28, 2 }
 0x27e   :  { %v1568_v56 = vpop.permute.xlu1 %1567  ;;  %v1473_v45 = vadd.f32 %v1472_v2, %v1471_v21  ;;  %v1486_v3 = vrot.slane %v1485_v60, 1  ;;  %v1479_v34 = vrot.slane %v1478_v62, 1  ;;  %v1450_v63 = vadd.f32 %v1449_v5, %v1448_v58 }
 0x27f   :  { %v1638_v31 = vsel %vm1637_vm1, %v1606_v48, %v1605_v18  ;;  %v1613_v57 = vmul.f32 %v1568_v56, %v1459_v25  ;;  %v1497_v42 = vadd.f32 %v1496_v15, %v1495_v36  ;;  %v1429_v25 = vadd.f32 %v1428_v0, %v1427_v26 }
 0x280   :  { %v1573_v24 = vpop.permute.xlu0 %1572  ;;  %v1504_v23 = vadd.f32 %v1503_v39, %v1502_v4  ;;  %v1443_v11 = vadd.f32 %v1442_v27, %v1441_v28  ;;  %v1487_v47 = vadd.f32 %v1486_v3, %v1485_v60  ;;  %v1451_v40 = vrot.slane %v1450_v63, 1 }
 0x281   :  { %v1614_v44 = vmul.f32 %v1573_v24, %v1466_v20  ;;  %v1498_v10 = vrot.slane %v1497_v42, 2  ;;  %v1430_v55 = vrot.slane %v1429_v25, 1  ;;  %v1437_v20 = vrot.slane %v1436_v1, 1 }
 0x282   :  { %v1543_v16 = vpop.permute.xlu1 %1542  ;;  %v1505_v18 = vrot.slane %v1504_v23, 2  ;;  %v1444_v61 = vrot.slane %v1443_v11, 1  ;;  %v1494_v43 = vadd.f32 %v1493_v41, %v1492_v29  ;;  %v1452_v21 = vadd.f32 %v1451_v40, %v1450_v63 }
 0x283   :  { %v1651_v32 = vsel %vm1637_vm1, %v1614_v44, %v1613_v57  ;;  %v1608_v59 = vmul.f32 %v1543_v16, %v1424_v49  ;;  %v1499_v36 = vadd.f32 %v1498_v10, %v1497_v42  ;;  %v1431_v48 = vadd.f32 %v1430_v55, %v1429_v25 }
 0x284   :  { %v1583_v17 = vpop.permute.xlu0 %1582  ;;  %v1506_v56 = vadd.f32 %v1505_v18, %v1504_v23  ;;  %v1480_v57 = vadd.f32 %v1479_v34, %v1478_v62  ;;  %v1445_v46 = vadd.f32 %v1444_v61, %v1443_v11  ;;  %v1438_v44 = vadd.f32 %v1437_v20, %v1436_v1 }
 0x285   :  { %v1500_v4 = vrot.slane %v1499_v36, 1 }
 0x286   :  { %v1538_v6 = vpop.permute.xlu1 %1537  ;;  %v1616_v38 = vmul.f32 %v1583_v17, %v1480_v57  ;;  %v1507_v22 = vrot.slane %v1506_v56, 1 }
 0x287   :  { %v1607_v7 = vmul.f32 %v1538_v6, %v1417_v14  ;;  %v1501_v30 = vadd.f32 %v1500_v4, %v1499_v36 }
 0x288   :  { %v1578_v19 = vpop.permute.xlu0 %1577  ;;  %v1508_v33 = vadd.f32 %v1507_v22, %v1506_v56 }
 0x289   :  { %v1640_v54 = vsel %vm1639_vm2, %v1607_v7, %v1638_v31  ;;  %v1615_v35 = vmul.f32 %v1578_v19, %v1473_v45 }
 0x28a   :  { %v1553_v8 = vpop.permute.xlu1 %1552  ;;  %v1642_v9 = vsel %vm1641_vm3, %v1608_v59, %v1640_v54 }
 0x28b   :  { %v1652_v24 = vsel %vm1639_vm2, %v1615_v35, %v1651_v32  ;;  %v1610_v42 = vmul.f32 %v1553_v8, %v1438_v44 }
 0x28c   :  { %v1593_v12 = vpop.permute.xlu0 %1592  ;;  %v1653_v39 = vsel %vm1641_vm3, %v1616_v38, %v1652_v24 }
 0x28d   :  { %v1618_v58 = vmul.f32 %v1593_v12, %v1494_v43 }
 0x28e   :  { %v1548_v26 = vpop.permute.xlu1 %1547 }
 0x28f   :  { %v1609_v31 = vmul.f32 %v1548_v26, %v1431_v48 }
 0x290   :  { %v1588_v37 = vpop.permute.xlu0 %1587 }
 0x291   :  { %v1617_v15 = vmul.f32 %v1588_v37, %v1487_v47  ;;  %v1644_v16 = vsel %vm1643_vm4, %v1609_v31, %v1642_v9 }
 0x292   :  { %v1558_v13 = vpop.permute.xlu1 %1557  ;;  %v1646_v17 = vsel %vm1645_vm5, %v1610_v42, %v1644_v16 }
 0x293   :  { %v1611_v0 = vmul.f32 %v1558_v13, %v1445_v46  ;;  %v1654_v51 = vsel %vm1643_vm4, %v1617_v15, %v1653_v39 }
 0x294   :  { %v1598_v28 = vpop.permute.xlu0 %1597  ;;  %v1655_v25 = vsel %vm1645_vm5, %v1618_v58, %v1654_v51 }
 0x295   :  { %v1619_v32 = vmul.f32 %v1598_v28, %v1501_v30  ;;  %v1648_v6 = vsel %vm1647_vm6, %v1611_v0, %v1646_v17 }
 0x296   :  { %v1563_v53 = vpop.permute.xlu1 %1562 }
 0x297   :  { %v1612_v14 = vmul.f32 %v1563_v53, %v1452_v21  ;;  %v1656_v7 = vsel %vm1647_vm6, %v1619_v32, %v1655_v25 }
 0x298   :  { %v1603_v49 = vpop.permute.xlu0 %1602 }
 0x299   :  { %v1620_v27 = vmul.f32 %v1603_v49, %v1508_v33  ;;  %v1650_v23 = vsel %vm1649_vm7, %v1612_v14, %v1648_v6 }
 0x29a   :  { %1660 = vst [vmem:[#allocation2] sm:$0xff] %v1650_v23 }
 0x29b   :  { %v1657_v50 = vsel %vm1649_vm7, %v1620_v27, %v1656_v7 }
 0x29c   :  { %1661 = vst [vmem:[#allocation2 + $0x8] sm:$0xff] %v1657_v50 }
 0x29d   :  { %1963 = shalt.err (!%p1960_p4)
}
 0x29e   :  { %s1964_s7 = scalar_lea.hbm %s2697_s5, 256 }
 0x29f   :  { %p1965_p5 = scmp.ne.s32.totalorder %s2697_s5, %s1964_s7  ;;  %p1968_p6 = scmp.lt.u32.totalorder %s1964_s7, %s2697_s5 }
 0x2a1   :  { %p1970_p7 = pnand %p1968_p6, %p1965_p5 }
 0x2a3   :  { %1973 = shalt.err (!%p1970_p7)
}
 0x2a4   :  { %s1979_s12 = smov 128   ;;  %s1980_s13 = smov 8  }
 0x2a5   :  { %1673 = dma.vmem_to_hbm [thread:$0]  %s1668_s28, 256, %s2697_s5, [#allocation3], %s1979_s12, %s1979_s12, %s1980_s13  }
 0x2a6   :  { %1974 = dma.done.wait [#allocation3], 256  }
 0x2a7   :  { %1975 = vsyncadd [#allocation3], 4294967040 }
 0x2a8   :  { %1677 = vsyncpa [#allocation3], 1 }

</bundles_post_ra>
